<compile_context>
chip_gen: v7x
topology: tpu7x:2x2x1
jax: 0.10.0
libtpu: 0.0.40
codegen_flags: <defaults>
</compile_context>

<pallas_src>
import numpy as np
import jax
import jax.numpy as jnp
from jax import lax
from jax.experimental import pallas as pl
from jax.experimental.pallas import tpu as pltpu

# ---- problem sizes (small, consistent with the module's MLP config) ----
BATCH = 8
DIM_IN = 16
DIM_Z = 8
DIM_U = 2
H_ENC = 32
H_DEC = 32
H_TR = 32
BN_EPS = 1e-5

W_COLS = 32          # columns of the main weight / vector slabs (zero padded)
ACT_COLS = 32        # packed activation slab width
OUT_COLS = 128       # lane-dense output slab width
ZW_COLS = 128        # fused z-head weight block: [dw1 | tw1 | wB_perm | wo | 0]
ZW_TW1 = 32          # lane offset of tw1 inside the z-head block
ZW_BO = 64           # lane offset of [wB_perm | wo] inside the z-head block

# Main weight slab layout (row offsets are multiples of the bf16 sublane tile).
_W_SHAPES = [
    ("ew1", DIM_IN),   # (16, 32)
    ("ew2", H_ENC),    # (32, 32)
    ("ew3", H_ENC),    # (32, 16) [mean | logvar]  (lane padded to 32)
    ("dw2", H_DEC),    # (32, 32)
    ("dw3", H_DEC),    # (32, 16)
    ("tw2", H_TR),     # (32, 32)
    ("tw3", H_TR),     # (32, 16) [v | r]
]
W_LAYOUT = {}
_off = 0
for _n, _r in _W_SHAPES:
    W_LAYOUT[_n] = (_off, _r)
    _off += _r
W_ROWS = _off          # 208

# Bias / BN-vector slab layout.  Linear biases that feed a BatchNorm are NOT
# stored (BN cancels them exactly).
V_NAMES = ["eg1", "ebt1", "eg2", "ebt2", "eb3",
           "dg1", "dbt1", "dg2", "dbt2", "db3",
           "tg1", "tbt1", "tg2", "tbt2", "tg3", "tbt3",
           "bBo"]
V_INDEX = {n: i for i, n in enumerate(V_NAMES)}
V_ROWS = 24            # padded to a multiple of 8 sublanes


# --------------------------------------------------------------------------
# Pallas kernel (one grid step = one independent E2C forward instance)
# --------------------------------------------------------------------------
def e2c_kernel(act_ref, w_ref, zw_ref, vec_ref, out_ref):
    B = BATCH

    # ---- lazy parameter access: static slices of the packed slabs ----
    def w(name):
        off, rows = W_LAYOUT[name]
        return w_ref[off:off + rows, :]                 # (rows, 32) bf16

    def v(name):
        i = V_INDEX[name]
        return vec_ref[i:i + 1, :]                      # (1, 32) f32

    def dot(x, wgt):
        # bf16 MXU operands, f32 accumulation.
        return jnp.dot(x.astype(jnp.bfloat16), wgt,
                       preferred_element_type=jnp.float32)

    # ---- BatchNorm1d (train mode, biased variance) with folded affine ----
    def bn_apply(h, mu, var, gname, btname, relu):
        scale = v(gname) * lax.rsqrt(var + BN_EPS)
        shift = v(btname) - mu * scale
        hn = h * scale + shift
        return jnp.maximum(hn, 0.0) if relu else hn

    def bn1(h, gname, btname, relu=True):
        # single-group statistics over all rows
        inv_n = 1.0 / h.shape[0]
        mu = jnp.sum(h, axis=0, keepdims=True) * inv_n
        mq = jnp.sum(h * h, axis=0, keepdims=True) * inv_n
        return bn_apply(h, mu, mq - mu * mu, gname, btname, relu)

    def bn2(h, gname, btname, relu=True):
        # per-half statistics (rows 0:B and B:2B) computed full-width with a
        # row mask -> preserves separate encoder/decoder call semantics while
        # both halves are normalized in one pass (no slice / concat).
        half = h.shape[0] // 2
        inv_n = 1.0 / half
        top = lax.broadcasted_iota(jnp.int32, h.shape, 0) < half
        hsq = h * h
        mu_t = jnp.sum(jnp.where(top, h, 0.0), axis=0, keepdims=True) * inv_n
        mu_b = jnp.sum(jnp.where(top, 0.0, h), axis=0, keepdims=True) * inv_n
        mq_t = jnp.sum(jnp.where(top, hsq, 0.0), axis=0, keepdims=True) * inv_n
        mq_b = jnp.sum(jnp.where(top, 0.0, hsq), axis=0, keepdims=True) * inv_n
        mu = jnp.where(top, mu_t, mu_b)
        mq = jnp.where(top, mq_t, mq_b)
        return bn_apply(h, mu, mq - mu * mu, gname, btname, relu)

    # ---- unpack the packed activation slab for this instance ----
    act = act_ref[0]                                    # (2B, 32) f32
    x2 = act[:, 0:DIM_IN]                               # rows 0:B = x, B:2B = x_next
    eps2 = act[:, DIM_IN:DIM_IN + DIM_Z]                # rows 0:B = eps, B:2B = eps'
    u = act[0:B, DIM_IN + DIM_Z:DIM_IN + DIM_Z + DIM_U]

    # ---- fused encoder (x and x_next share the Linear layers) ----
    h = bn2(dot(x2, w("ew1")), "eg1", "ebt1")           # bias dropped (BN follows)
    h = bn2(dot(h, w("ew2")), "eg2", "ebt2")
    ml = dot(h, w("ew3")) + v("eb3")                    # (2B, 32): [mean | logvar | pad]
    mean2 = ml[:, 0:DIM_Z]
    logvar2 = ml[:, DIM_Z:2 * DIM_Z]

    # ---- reparameterization for both samples at once (f32) ----
    z2 = eps2 * jnp.exp(0.5 * logvar2) + mean2          # (2B, DIM_Z)
    z = z2[0:B]

    # ---- fused z-head matmul: [dw1 | tw1 | wB_perm | wo] in one lane-dense dot
    zh = dot(z2, zw_ref[...])                           # (2B, 128) f32
    hd1 = zh[:, 0:H_DEC]                                # dw1 @ z2 (both halves)
    ht1 = zh[0:B, ZW_TW1:ZW_TW1 + H_TR]                 # tw1 @ z
    bvo = zh[0:B, ZW_BO:ZW_BO + 32] + v("bBo")          # [B_flat_perm | o | 0] + bias

    # ---- decoder on z / z_next (first layer comes from the fused dot) ----
    hd = bn2(hd1, "dg1", "dbt1")
    hd = bn2(dot(hd, w("dw2")), "dg2", "dbt2")
    dec2 = jax.nn.sigmoid(dot(hd, w("dw3")) + v("db3"))  # (2B, 32), lanes 0:16 real

    # ---- transition: z -> z_next_pred ----
    ht = bn1(ht1, "tg1", "tbt1")
    ht = bn1(dot(ht, w("tw2")), "tg2", "tbt2")
    vr = jax.nn.sigmoid(bn1(dot(ht, w("tw3")), "tg3", "tbt3", relu=False))
    v_vec = vr[:, 0:DIM_Z]
    r_vec = vr[:, DIM_Z:2 * DIM_Z]

    b_flat = bvo[:, 0:DIM_Z * DIM_U]                    # j-major: [:, :8]=j0, [:, 8:16]=j1
    o = bvo[:, DIM_Z * DIM_U:DIM_Z * DIM_U + DIM_Z]
    bu = b_flat[:, 0:DIM_Z] * u[:, 0:1] + b_flat[:, DIM_Z:2 * DIM_Z] * u[:, 1:2]

    # A z = (I + v r^T) z = z + v * (r . z)
    az = z + v_vec * jnp.sum(r_vec * z, axis=1, keepdims=True)
    z_pred = az + bu + o

    # ---- decoder on z_next_pred (dw1 reused from the fused z-head block) ----
    hp = bn1(dot(z_pred, zw_ref[:, 0:H_DEC]), "dg1", "dbt1")
    hp = bn1(dot(hp, w("dw2")), "dg2", "dbt2")
    dec_p = jax.nn.sigmoid(dot(hp, w("dw3")) + v("db3"))  # (B, 32)

    # ---- single lane-dense (B, 128) output store ----
    pad = jnp.zeros((B, OUT_COLS - 96), jnp.float32)
    out_ref[0] = jnp.concatenate([dec2[0:B], dec2[B:], dec_p, pad], axis=1)
    # TODO(synk): NormalDistribution bookkeeping (Qz, Qz_next, Qz_next_pred) is not
    # part of the returned tensor and is not materialized here.


# --------------------------------------------------------------------------
# Parameter init / packing (wrapper side)
# --------------------------------------------------------------------------
def init_params(key):
    params = {}

    def linear_init(key, fan_in, fan_out):
        kw, kb = jax.random.split(key)
        bound = 1.0 / np.sqrt(fan_in)
        wgt = jax.random.uniform(kw, (fan_in, fan_out), jnp.float32, -bound, bound)
        b = jax.random.uniform(kb, (1, fan_out), jnp.float32, -bound, bound)
        return wgt, b

    def bn_init(n):
        return jnp.ones((1, n), jnp.float32), jnp.zeros((1, n), jnp.float32)

    keys = iter(jax.random.split(key, 32))
    # encoder
    params["ew1"], params["eb1"] = linear_init(next(keys), DIM_IN, H_ENC)
    params["eg1"], params["ebt1"] = bn_init(H_ENC)
    params["ew2"], params["eb2"] = linear_init(next(keys), H_ENC, H_ENC)
    params["eg2"], params["ebt2"] = bn_init(H_ENC)
    params["ew3m"], params["eb3m"] = linear_init(next(keys), H_ENC, DIM_Z)
    params["ew3l"], params["eb3l"] = linear_init(next(keys), H_ENC, DIM_Z)
    # decoder
    params["dw1"], params["db1"] = linear_init(next(keys), DIM_Z, H_DEC)
    params["dg1"], params["dbt1"] = bn_init(H_DEC)
    params["dw2"], params["db2"] = linear_init(next(keys), H_DEC, H_DEC)
    params["dg2"], params["dbt2"] = bn_init(H_DEC)
    params["dw3"], params["db3"] = linear_init(next(keys), H_DEC, DIM_IN)
    # transition net
    params["tw1"], params["tb1"] = linear_init(next(keys), DIM_Z, H_TR)
    params["tg1"], params["tbt1"] = bn_init(H_TR)
    params["tw2"], params["tb2"] = linear_init(next(keys), H_TR, H_TR)
    params["tg2"], params["tbt2"] = bn_init(H_TR)
    params["tw3v"], params["tb3v"] = linear_init(next(keys), H_TR, DIM_Z)
    params["tg3v"], params["tbt3v"] = bn_init(DIM_Z)
    params["tw3r"], params["tb3r"] = linear_init(next(keys), H_TR, DIM_Z)
    params["tg3r"], params["tbt3r"] = bn_init(DIM_Z)
    # transition heads
    params["wB"], params["bB"] = linear_init(next(keys), DIM_Z, DIM_Z * DIM_U)
    params["wo"], params["bo"] = linear_init(next(keys), DIM_Z, DIM_Z)
    return params


def _pad_cols(a, width):
    return jnp.pad(a, ((0, 0), (0, width - a.shape[1])))


def pack_params(p):
    """Pack all weights / vectors into three slabs (bf16 weights, f32 vectors)."""
    # main weight slab: everything multiplying a hidden (32-wide) activation
    w_blocks = [
        p["ew1"], p["ew2"],
        jnp.concatenate([p["ew3m"], p["ew3l"]], axis=1),
        p["dw2"], p["dw3"],
        p["tw2"],
        jnp.concatenate([p["tw3v"], p["tw3r"]], axis=1),
    ]
    w_slab = jnp.concatenate([_pad_cols(b, W_COLS) for b in w_blocks], axis=0)
    assert w_slab.shape == (W_ROWS, W_COLS)
    w_slab = w_slab.astype(jnp.bfloat16)

    # fused z-head block: everything multiplying z / z2 (K = DIM_Z), lane-dense.
    # wB is permuted to j-major so B@u becomes two elementwise multiply-adds.
    wb_perm = p["wB"].reshape(DIM_Z, DIM_Z, DIM_U).transpose(0, 2, 1) \
                     .reshape(DIM_Z, DIM_Z * DIM_U)
    zw = jnp.concatenate([p["dw1"], p["tw1"], wb_perm, p["wo"]], axis=1)   # (8, 88)
    zw_slab = _pad_cols(zw, ZW_COLS).astype(jnp.bfloat16)
    assert zw_slab.shape == (DIM_Z, ZW_COLS)

    # bias / BN vector slab (f32).  Linear biases that feed a BatchNorm
    # (eb1/eb2/db1/db2/tb1/tb2/tb3) are dropped — BN cancels them exactly.
    bb_perm = p["bB"].reshape(1, DIM_Z, DIM_U).transpose(0, 2, 1) \
                     .reshape(1, DIM_Z * DIM_U)
    v_blocks = [
        p["eg1"], p["ebt1"], p["eg2"], p["ebt2"],
        jnp.concatenate([p["eb3m"], p["eb3l"]], axis=1),
        p["dg1"], p["dbt1"], p["dg2"], p["dbt2"], p["db3"],
        p["tg1"], p["tbt1"], p["tg2"], p["tbt2"],
        jnp.concatenate([p["tg3v"], p["tg3r"]], axis=1),
        jnp.concatenate([p["tbt3v"], p["tbt3r"]], axis=1),
        jnp.concatenate([bb_perm, p["bo"]], axis=1),
    ]
    v_slab = jnp.concatenate([_pad_cols(b, W_COLS) for b in v_blocks], axis=0)
    v_slab = jnp.pad(v_slab, ((0, V_ROWS - v_slab.shape[0]), (0, 0)))
    assert v_slab.shape == (V_ROWS, W_COLS)
    return w_slab, zw_slab, v_slab


def pack_activations(x, u, x_next, eps, eps_next):
    """(N, B, .) inputs -> one (N, 2B, 32) lane-packed activation slab."""
    n = x.shape[0]
    pad_top = jnp.zeros((n, BATCH, ACT_COLS - DIM_IN - DIM_Z - DIM_U), jnp.float32)
    pad_bot = jnp.zeros((n, BATCH, ACT_COLS - DIM_IN - DIM_Z), jnp.float32)
    top = jnp.concatenate([x, eps, u, pad_top], axis=2)
    bot = jnp.concatenate([x_next, eps_next, pad_bot], axis=2)
    return jnp.concatenate([top, bot], axis=1)          # (N, 2B, 32)


# --------------------------------------------------------------------------
# Forward wrapper: leading axis = independent forward instances (grid axis)
# --------------------------------------------------------------------------
@jax.jit
def e2c_forward(x, action, x_next, eps, eps_next, w_slab, zw_slab, v_slab):
    n = x.shape[0]
    act = pack_activations(x, action, x_next, eps, eps_next)       # (n, 2B, 32)
    out = pl.pallas_call(
        e2c_kernel,
        out_shape=jax.ShapeDtypeStruct((n, BATCH, OUT_COLS), jnp.float32),
        grid=(n,),
        in_specs=[
            pl.BlockSpec((1, 2 * BATCH, ACT_COLS), lambda i: (i, 0, 0)),
            pl.BlockSpec((W_ROWS, W_COLS), lambda i: (0, 0)),       # VMEM-resident
            pl.BlockSpec((DIM_Z, ZW_COLS), lambda i: (0, 0)),       # VMEM-resident
            pl.BlockSpec((V_ROWS, W_COLS), lambda i: (0, 0)),       # VMEM-resident
        ],
        out_specs=pl.BlockSpec((1, BATCH, OUT_COLS), lambda i: (i, 0, 0)),
        compiler_params=pltpu.CompilerParams(
            dimension_semantics=("parallel",)),
    )(act, w_slab, zw_slab, v_slab)
    x_dec = out[:, :, 0:DIM_IN]
    x_next_dec = out[:, :, 32:32 + DIM_IN]
    x_next_pred_dec = out[:, :, 64:64 + DIM_IN]
    # forward() returns x_next_pred_dec (x_dec / x_next_dec live on `self` in torch).
    return x_next_pred_dec, (x_dec, x_next_dec)


# --------------------------------------------------------------------------
# Pure-JAX reference (unfused, mirrors the PyTorch graph).
# bf16_dots=True reproduces the kernel's MXU numerics for a tight check.
# --------------------------------------------------------------------------
def e2c_reference(x, u, x_next, eps, eps_next, p, *, bf16_dots=False):
    cast = (lambda a: a.astype(jnp.bfloat16)) if bf16_dots else (lambda a: a)

    def lin(h, wgt, b):
        return jnp.dot(cast(h), cast(wgt), preferred_element_type=jnp.float32) + b

    def bn(h, g, bt):
        mu = jnp.mean(h, axis=0, keepdims=True)
        var = jnp.mean(jnp.square(h - mu), axis=0, keepdims=True)
        return (h - mu) / jnp.sqrt(var + BN_EPS) * g + bt

    def bn_relu(h, g, bt):
        return jnp.maximum(bn(h, g, bt), 0.0)

    def encode(xx):
        h = bn_relu(lin(xx, p["ew1"], p["eb1"]), p["eg1"], p["ebt1"])
        h = bn_relu(lin(h, p["ew2"], p["eb2"]), p["eg2"], p["ebt2"])
        return lin(h, p["ew3m"], p["eb3m"]), lin(h, p["ew3l"], p["eb3l"])

    def decode(zz):
        h = bn_relu(lin(zz, p["dw1"], p["db1"]), p["dg1"], p["dbt1"])
        h = bn_relu(lin(h, p["dw2"], p["db2"]), p["dg2"], p["dbt2"])
        return jax.nn.sigmoid(lin(h, p["dw3"], p["db3"]))

    mean, logvar = encode(x)
    mean_n, logvar_n = encode(x_next)
    z = eps * jnp.exp(0.5 * logvar) + mean
    z_n = eps_next * jnp.exp(0.5 * logvar_n) + mean_n
    x_dec = decode(z)
    x_next_dec = decode(z_n)
    h = bn_relu(lin(z, p["tw1"], p["tb1"]), p["tg1"], p["tbt1"])
    h = bn_relu(lin(h, p["tw2"], p["tb2"]), p["tg2"], p["tbt2"])
    v = jax.nn.sigmoid(bn(lin(h, p["tw3v"], p["tb3v"]), p["tg3v"], p["tbt3v"]))
    r = jax.nn.sigmoid(bn(lin(h, p["tw3r"], p["tb3r"]), p["tg3r"], p["tbt3r"]))
    b_flat = lin(z, p["wB"], p["bB"])
    o = lin(z, p["wo"], p["bo"])
    bu = jnp.einsum("bij,bj->bi", b_flat.reshape(BATCH, DIM_Z, DIM_U), u)
    z_pred = z + v * jnp.sum(r * z, axis=1, keepdims=True) + bu + o
    return decode(z_pred), x_dec, x_next_dec


if __name__ == "__main__":
    key = jax.random.PRNGKey(0)
    k_params, k_x, k_xn, k_u, k_e1, k_e2 = jax.random.split(key, 6)

    params = init_params(k_params)
    w_slab, zw_slab, v_slab = pack_params(params)

    N_INST = 4   # independent forward instances batched on the grid axis
    xs = jax.random.uniform(k_x, (N_INST, BATCH, DIM_IN), jnp.float32)
    xns = jax.random.uniform(k_xn, (N_INST, BATCH, DIM_IN), jnp.float32)
    us = jax.random.normal(k_u, (N_INST, BATCH, DIM_U), jnp.float32)
    eps = jax.random.normal(k_e1, (N_INST, BATCH, DIM_Z), jnp.float32)
    epsn = jax.random.normal(k_e2, (N_INST, BATCH, DIM_Z), jnp.float32)

    preds, (x_decs, x_next_decs) = e2c_forward(
        xs, us, xns, eps, epsn, w_slab, zw_slab, v_slab)
    jax.block_until_ready(preds)

    # sanity checks
    assert preds.shape == (N_INST, BATCH, DIM_IN)
    assert bool(jnp.all(jnp.isfinite(preds)))

    # Tight check against a reference with matched bf16-MXU numerics (validates
    # all structural fusions), plus a loose guard against the pure-f32 graph
    # (quantifies the intentional bf16 drift, catches catastrophic divergence).
    err_matched = 0.0
    err_f32 = 0.0
    for i in range(N_INST):
        rp_b, rd_b, rn_b = e2c_reference(xs[i], us[i], xns[i], eps[i], epsn[i],
                                         params, bf16_dots=True)
        rp_f, rd_f, rn_f = e2c_reference(xs[i], us[i], xns[i], eps[i], epsn[i],
                                         params, bf16_dots=False)
        err_matched = max(err_matched,
                          float(jnp.max(jnp.abs(preds[i] - rp_b))),
                          float(jnp.max(jnp.abs(x_decs[i] - rd_b))),
                          float(jnp.max(jnp.abs(x_next_decs[i] - rn_b))))
        err_f32 = max(err_f32,
                      float(jnp.max(jnp.abs(preds[i] - rp_f))),
                      float(jnp.max(jnp.abs(x_decs[i] - rd_f))),
                      float(jnp.max(jnp.abs(x_next_decs[i] - rn_f))))
    assert err_matched < 3e-3, f"kernel vs bf16-matched reference: {err_matched}"
    assert err_f32 < 0.5, f"kernel vs f32 reference (bf16 drift guard): {err_f32}"

    print("KERNEL_OK")
</pallas_src>

<mosaic_0001>
module attributes {stable_mosaic.version = 11 : i64} {
  func.func @e2c_kernel(%arg0: i32, %arg1: memref<1x16x32xf32, #tpu.memory_space<vmem>>, %arg2: memref<208x32xbf16, #tpu.memory_space<vmem>>, %arg3: memref<8x128xbf16, #tpu.memory_space<vmem>>, %arg4: memref<24x32xf32, #tpu.memory_space<vmem>>, %arg5: memref<1x8x128xf32, #tpu.memory_space<vmem>>) attributes {dimension_semantics = [#tpu.dimension_semantics<parallel>], iteration_bounds = array<i64: 4>, scalar_prefetch = 0 : i64, scratch_operands = 0 : i64, tpu.core_type = #tpu.core_type<tc>, window_params = [{transform_indices = @transform_0, window_bounds = array<i64: 1, 16, 32>}, {pipeline_mode = #tpu.pipeline_mode<synchronous>, transform_indices = @transform_1, window_bounds = array<i64: 208, 32>}, {pipeline_mode = #tpu.pipeline_mode<synchronous>, transform_indices = @transform_2, window_bounds = array<i64: 8, 128>}, {pipeline_mode = #tpu.pipeline_mode<synchronous>, transform_indices = @transform_3, window_bounds = array<i64: 24, 32>}, {transform_indices = @transform_4, window_bounds = array<i64: 1, 8, 128>}]} {
    %c0 = arith.constant 0 : index
    %c0_0 = arith.constant 0 : index
    %c0_1 = arith.constant 0 : index
    %0 = vector.load %arg1[%c0, %c0_0, %c0_1] : memref<1x16x32xf32, #tpu.memory_space<vmem>>, vector<1x16x32xf32>
    %1 = vector.shape_cast %0 : vector<1x16x32xf32> to vector<16x32xf32>
    %2 = vector.extract_strided_slice %1 {offsets = [0, 0], sizes = [16, 16], strides = [1, 1]} : vector<16x32xf32> to vector<16x16xf32>
    %3 = vector.extract_strided_slice %1 {offsets = [0, 16], sizes = [16, 8], strides = [1, 1]} : vector<16x32xf32> to vector<16x8xf32>
    %4 = vector.extract_strided_slice %1 {offsets = [0, 24], sizes = [8, 2], strides = [1, 1]} : vector<16x32xf32> to vector<8x2xf32>
    %c0_2 = arith.constant 0 : index
    %c0_3 = arith.constant 0 : index
    %5 = vector.load %arg2[%c0_2, %c0_3] : memref<208x32xbf16, #tpu.memory_space<vmem>>, vector<16x32xbf16>
    %6 = arith.truncf %2 : vector<16x16xf32> to vector<16x16xbf16>
    %cst = arith.constant dense<0.000000e+00> : vector<16x32xf32>
    %7 = tpu.matmul %6, %5, %cst {dimension_numbers = #tpu.dot_dimension_numbers<[1], [0], [0], [1], [0, 0, 1, 1], [], []>} : vector<16x16xbf16>, vector<16x32xbf16>, vector<16x32xf32> -> vector<16x32xf32>
    %8 = tpu.iota {dimensions = array<i32: 0>} : vector<16x32xi32>
    %c8_i32 = arith.constant 8 : i32
    %9 = vector.broadcast %c8_i32 : i32 to vector<16x32xi32>
    %10 = arith.cmpi slt, %8, %9 : vector<16x32xi32>
    %11 = arith.mulf %7, %7 : vector<16x32xf32>
    %cst_4 = arith.constant 0.000000e+00 : f32
    %12 = vector.broadcast %cst_4 : f32 to vector<16x32xf32>
    %13 = arith.select %10, %7, %12 : vector<16x32xi1>, vector<16x32xf32>
    %cst_5 = arith.constant dense<0.000000e+00> : vector<32xf32>
    %14 = vector.multi_reduction <add>, %13, %cst_5 [0] : vector<16x32xf32> to vector<32xf32>
    %15 = vector.shape_cast %14 : vector<32xf32> to vector<1x32xf32>
    %cst_6 = arith.constant 1.250000e-01 : f32
    %16 = vector.broadcast %cst_6 : f32 to vector<1x32xf32>
    %17 = arith.mulf %15, %16 : vector<1x32xf32>
    %cst_7 = arith.constant 0.000000e+00 : f32
    %18 = vector.broadcast %cst_7 : f32 to vector<16x32xf32>
    %19 = arith.select %10, %18, %7 : vector<16x32xi1>, vector<16x32xf32>
    %cst_8 = arith.constant dense<0.000000e+00> : vector<32xf32>
    %20 = vector.multi_reduction <add>, %19, %cst_8 [0] : vector<16x32xf32> to vector<32xf32>
    %21 = vector.shape_cast %20 : vector<32xf32> to vector<1x32xf32>
    %cst_9 = arith.constant 1.250000e-01 : f32
    %22 = vector.broadcast %cst_9 : f32 to vector<1x32xf32>
    %23 = arith.mulf %21, %22 : vector<1x32xf32>
    %cst_10 = arith.constant 0.000000e+00 : f32
    %24 = vector.broadcast %cst_10 : f32 to vector<16x32xf32>
    %25 = arith.select %10, %11, %24 : vector<16x32xi1>, vector<16x32xf32>
    %cst_11 = arith.constant dense<0.000000e+00> : vector<32xf32>
    %26 = vector.multi_reduction <add>, %25, %cst_11 [0] : vector<16x32xf32> to vector<32xf32>
    %27 = vector.shape_cast %26 : vector<32xf32> to vector<1x32xf32>
    %cst_12 = arith.constant 1.250000e-01 : f32
    %28 = vector.broadcast %cst_12 : f32 to vector<1x32xf32>
    %29 = arith.mulf %27, %28 : vector<1x32xf32>
    %cst_13 = arith.constant 0.000000e+00 : f32
    %30 = vector.broadcast %cst_13 : f32 to vector<16x32xf32>
    %31 = arith.select %10, %30, %11 : vector<16x32xi1>, vector<16x32xf32>
    %cst_14 = arith.constant dense<0.000000e+00> : vector<32xf32>
    %32 = vector.multi_reduction <add>, %31, %cst_14 [0] : vector<16x32xf32> to vector<32xf32>
    %33 = vector.shape_cast %32 : vector<32xf32> to vector<1x32xf32>
    %cst_15 = arith.constant 1.250000e-01 : f32
    %34 = vector.broadcast %cst_15 : f32 to vector<1x32xf32>
    %35 = arith.mulf %33, %34 : vector<1x32xf32>
    %36 = vector.shape_cast %17 : vector<1x32xf32> to vector<1x32xf32>
    %37 = vector.broadcast %36 : vector<1x32xf32> to vector<16x32xf32>
    %38 = vector.shape_cast %23 : vector<1x32xf32> to vector<1x32xf32>
    %39 = vector.broadcast %38 : vector<1x32xf32> to vector<16x32xf32>
    %40 = arith.select %10, %37, %39 : vector<16x32xi1>, vector<16x32xf32>
    %41 = vector.shape_cast %29 : vector<1x32xf32> to vector<1x32xf32>
    %42 = vector.broadcast %41 : vector<1x32xf32> to vector<16x32xf32>
    %43 = vector.shape_cast %35 : vector<1x32xf32> to vector<1x32xf32>
    %44 = vector.broadcast %43 : vector<1x32xf32> to vector<16x32xf32>
    %45 = arith.select %10, %42, %44 : vector<16x32xi1>, vector<16x32xf32>
    %46 = arith.mulf %40, %40 : vector<16x32xf32>
    %47 = arith.subf %45, %46 : vector<16x32xf32>
    %c0_16 = arith.constant 0 : index
    %c0_17 = arith.constant 0 : index
    %48 = vector.load %arg4[%c0_16, %c0_17] : memref<24x32xf32, #tpu.memory_space<vmem>>, vector<1x32xf32>
    %cst_18 = arith.constant 9.99999974E-6 : f32
    %49 = vector.broadcast %cst_18 : f32 to vector<16x32xf32>
    %50 = arith.addf %47, %49 : vector<16x32xf32>
    %51 = math.rsqrt %50 : vector<16x32xf32>
    %52 = vector.broadcast %48 : vector<1x32xf32> to vector<16x32xf32>
    %53 = arith.mulf %52, %51 : vector<16x32xf32>
    %c1 = arith.constant 1 : index
    %c0_19 = arith.constant 0 : index
    %54 = vector.load %arg4[%c1, %c0_19] : memref<24x32xf32, #tpu.memory_space<vmem>>, vector<1x32xf32>
    %55 = arith.mulf %40, %53 : vector<16x32xf32>
    %56 = vector.broadcast %54 : vector<1x32xf32> to vector<16x32xf32>
    %57 = arith.subf %56, %55 : vector<16x32xf32>
    %58 = arith.mulf %7, %53 : vector<16x32xf32>
    %59 = arith.addf %58, %57 : vector<16x32xf32>
    %cst_20 = arith.constant 0.000000e+00 : f32
    %60 = vector.broadcast %cst_20 : f32 to vector<16x32xf32>
    %61 = arith.maximumf %59, %60 : vector<16x32xf32>
    %c16 = arith.constant 16 : index
    %c0_21 = arith.constant 0 : index
    %62 = vector.load %arg2[%c16, %c0_21] : memref<208x32xbf16, #tpu.memory_space<vmem>>, vector<32x32xbf16>
    %63 = arith.truncf %61 : vector<16x32xf32> to vector<16x32xbf16>
    %cst_22 = arith.constant dense<0.000000e+00> : vector<16x32xf32>
    %64 = tpu.matmul %63, %62, %cst_22 {dimension_numbers = #tpu.dot_dimension_numbers<[1], [0], [0], [1], [0, 0, 1, 1], [], []>} : vector<16x32xbf16>, vector<32x32xbf16>, vector<16x32xf32> -> vector<16x32xf32>
    %65 = tpu.iota {dimensions = array<i32: 0>} : vector<16x32xi32>
    %c8_i32_23 = arith.constant 8 : i32
    %66 = vector.broadcast %c8_i32_23 : i32 to vector<16x32xi32>
    %67 = arith.cmpi slt, %65, %66 : vector<16x32xi32>
    %68 = arith.mulf %64, %64 : vector<16x32xf32>
    %cst_24 = arith.constant 0.000000e+00 : f32
    %69 = vector.broadcast %cst_24 : f32 to vector<16x32xf32>
    %70 = arith.select %67, %64, %69 : vector<16x32xi1>, vector<16x32xf32>
    %cst_25 = arith.constant dense<0.000000e+00> : vector<32xf32>
    %71 = vector.multi_reduction <add>, %70, %cst_25 [0] : vector<16x32xf32> to vector<32xf32>
    %72 = vector.shape_cast %71 : vector<32xf32> to vector<1x32xf32>
    %cst_26 = arith.constant 1.250000e-01 : f32
    %73 = vector.broadcast %cst_26 : f32 to vector<1x32xf32>
    %74 = arith.mulf %72, %73 : vector<1x32xf32>
    %cst_27 = arith.constant 0.000000e+00 : f32
    %75 = vector.broadcast %cst_27 : f32 to vector<16x32xf32>
    %76 = arith.select %67, %75, %64 : vector<16x32xi1>, vector<16x32xf32>
    %cst_28 = arith.constant dense<0.000000e+00> : vector<32xf32>
    %77 = vector.multi_reduction <add>, %76, %cst_28 [0] : vector<16x32xf32> to vector<32xf32>
    %78 = vector.shape_cast %77 : vector<32xf32> to vector<1x32xf32>
    %cst_29 = arith.constant 1.250000e-01 : f32
    %79 = vector.broadcast %cst_29 : f32 to vector<1x32xf32>
    %80 = arith.mulf %78, %79 : vector<1x32xf32>
    %cst_30 = arith.constant 0.000000e+00 : f32
    %81 = vector.broadcast %cst_30 : f32 to vector<16x32xf32>
    %82 = arith.select %67, %68, %81 : vector<16x32xi1>, vector<16x32xf32>
    %cst_31 = arith.constant dense<0.000000e+00> : vector<32xf32>
    %83 = vector.multi_reduction <add>, %82, %cst_31 [0] : vector<16x32xf32> to vector<32xf32>
    %84 = vector.shape_cast %83 : vector<32xf32> to vector<1x32xf32>
    %cst_32 = arith.constant 1.250000e-01 : f32
    %85 = vector.broadcast %cst_32 : f32 to vector<1x32xf32>
    %86 = arith.mulf %84, %85 : vector<1x32xf32>
    %cst_33 = arith.constant 0.000000e+00 : f32
    %87 = vector.broadcast %cst_33 : f32 to vector<16x32xf32>
    %88 = arith.select %67, %87, %68 : vector<16x32xi1>, vector<16x32xf32>
    %cst_34 = arith.constant dense<0.000000e+00> : vector<32xf32>
    %89 = vector.multi_reduction <add>, %88, %cst_34 [0] : vector<16x32xf32> to vector<32xf32>
    %90 = vector.shape_cast %89 : vector<32xf32> to vector<1x32xf32>
    %cst_35 = arith.constant 1.250000e-01 : f32
    %91 = vector.broadcast %cst_35 : f32 to vector<1x32xf32>
    %92 = arith.mulf %90, %91 : vector<1x32xf32>
    %93 = vector.shape_cast %74 : vector<1x32xf32> to vector<1x32xf32>
    %94 = vector.broadcast %93 : vector<1x32xf32> to vector<16x32xf32>
    %95 = vector.shape_cast %80 : vector<1x32xf32> to vector<1x32xf32>
    %96 = vector.broadcast %95 : vector<1x32xf32> to vector<16x32xf32>
    %97 = arith.select %67, %94, %96 : vector<16x32xi1>, vector<16x32xf32>
    %98 = vector.shape_cast %86 : vector<1x32xf32> to vector<1x32xf32>
    %99 = vector.broadcast %98 : vector<1x32xf32> to vector<16x32xf32>
    %100 = vector.shape_cast %92 : vector<1x32xf32> to vector<1x32xf32>
    %101 = vector.broadcast %100 : vector<1x32xf32> to vector<16x32xf32>
    %102 = arith.select %67, %99, %101 : vector<16x32xi1>, vector<16x32xf32>
    %103 = arith.mulf %97, %97 : vector<16x32xf32>
    %104 = arith.subf %102, %103 : vector<16x32xf32>
    %c2 = arith.constant 2 : index
    %c0_36 = arith.constant 0 : index
    %105 = vector.load %arg4[%c2, %c0_36] : memref<24x32xf32, #tpu.memory_space<vmem>>, vector<1x32xf32>
    %cst_37 = arith.constant 9.99999974E-6 : f32
    %106 = vector.broadcast %cst_37 : f32 to vector<16x32xf32>
    %107 = arith.addf %104, %106 : vector<16x32xf32>
    %108 = math.rsqrt %107 : vector<16x32xf32>
    %109 = vector.broadcast %105 : vector<1x32xf32> to vector<16x32xf32>
    %110 = arith.mulf %109, %108 : vector<16x32xf32>
    %c3 = arith.constant 3 : index
    %c0_38 = arith.constant 0 : index
    %111 = vector.load %arg4[%c3, %c0_38] : memref<24x32xf32, #tpu.memory_space<vmem>>, vector<1x32xf32>
    %112 = arith.mulf %97, %110 : vector<16x32xf32>
    %113 = vector.broadcast %111 : vector<1x32xf32> to vector<16x32xf32>
    %114 = arith.subf %113, %112 : vector<16x32xf32>
    %115 = arith.mulf %64, %110 : vector<16x32xf32>
    %116 = arith.addf %115, %114 : vector<16x32xf32>
    %cst_39 = arith.constant 0.000000e+00 : f32
    %117 = vector.broadcast %cst_39 : f32 to vector<16x32xf32>
    %118 = arith.maximumf %116, %117 : vector<16x32xf32>
    %c48 = arith.constant 48 : index
    %c0_40 = arith.constant 0 : index
    %119 = vector.load %arg2[%c48, %c0_40] : memref<208x32xbf16, #tpu.memory_space<vmem>>, vector<32x32xbf16>
    %120 = arith.truncf %118 : vector<16x32xf32> to vector<16x32xbf16>
    %cst_41 = arith.constant dense<0.000000e+00> : vector<16x32xf32>
    %121 = tpu.matmul %120, %119, %cst_41 {dimension_numbers = #tpu.dot_dimension_numbers<[1], [0], [0], [1], [0, 0, 1, 1], [], []>} : vector<16x32xbf16>, vector<32x32xbf16>, vector<16x32xf32> -> vector<16x32xf32>
    %c4 = arith.constant 4 : index
    %c0_42 = arith.constant 0 : index
    %122 = vector.load %arg4[%c4, %c0_42] : memref<24x32xf32, #tpu.memory_space<vmem>>, vector<1x32xf32>
    %123 = vector.broadcast %122 : vector<1x32xf32> to vector<16x32xf32>
    %124 = arith.addf %121, %123 : vector<16x32xf32>
    %125 = vector.extract_strided_slice %124 {offsets = [0, 0], sizes = [16, 8], strides = [1, 1]} : vector<16x32xf32> to vector<16x8xf32>
    %126 = vector.extract_strided_slice %124 {offsets = [0, 8], sizes = [16, 8], strides = [1, 1]} : vector<16x32xf32> to vector<16x8xf32>
    %cst_43 = arith.constant 5.000000e-01 : f32
    %127 = vector.broadcast %cst_43 : f32 to vector<16x8xf32>
    %128 = arith.mulf %127, %126 : vector<16x8xf32>
    %129 = math.exp %128 : vector<16x8xf32>
    %130 = arith.mulf %3, %129 : vector<16x8xf32>
    %131 = arith.addf %130, %125 : vector<16x8xf32>
    %132 = vector.extract_strided_slice %131 {offsets = [0, 0], sizes = [8, 8], strides = [1, 1]} : vector<16x8xf32> to vector<8x8xf32>
    %c0_44 = arith.constant 0 : index
    %c0_45 = arith.constant 0 : index
    %133 = vector.load %arg3[%c0_44, %c0_45] : memref<8x128xbf16, #tpu.memory_space<vmem>>, vector<8x128xbf16>
    %134 = arith.truncf %131 : vector<16x8xf32> to vector<16x8xbf16>
    %cst_46 = arith.constant dense<0.000000e+00> : vector<16x128xf32>
    %135 = tpu.matmul %134, %133, %cst_46 {dimension_numbers = #tpu.dot_dimension_numbers<[1], [0], [0], [1], [0, 0, 1, 1], [], []>} : vector<16x8xbf16>, vector<8x128xbf16>, vector<16x128xf32> -> vector<16x128xf32>
    %136 = vector.extract_strided_slice %135 {offsets = [0, 0], sizes = [16, 32], strides = [1, 1]} : vector<16x128xf32> to vector<16x32xf32>
    %137 = vector.extract_strided_slice %135 {offsets = [0, 32], sizes = [8, 32], strides = [1, 1]} : vector<16x128xf32> to vector<8x32xf32>
    %138 = vector.extract_strided_slice %135 {offsets = [0, 64], sizes = [8, 32], strides = [1, 1]} : vector<16x128xf32> to vector<8x32xf32>
    %c16_47 = arith.constant 16 : index
    %c0_48 = arith.constant 0 : index
    %139 = vector.load %arg4[%c16_47, %c0_48] : memref<24x32xf32, #tpu.memory_space<vmem>>, vector<1x32xf32>
    %140 = vector.broadcast %139 : vector<1x32xf32> to vector<8x32xf32>
    %141 = arith.addf %138, %140 : vector<8x32xf32>
    %142 = tpu.iota {dimensions = array<i32: 0>} : vector<16x32xi32>
    %c8_i32_49 = arith.constant 8 : i32
    %143 = vector.broadcast %c8_i32_49 : i32 to vector<16x32xi32>
    %144 = arith.cmpi slt, %142, %143 : vector<16x32xi32>
    %145 = arith.mulf %136, %136 : vector<16x32xf32>
    %cst_50 = arith.constant 0.000000e+00 : f32
    %146 = vector.broadcast %cst_50 : f32 to vector<16x32xf32>
    %147 = arith.select %144, %136, %146 : vector<16x32xi1>, vector<16x32xf32>
    %cst_51 = arith.constant dense<0.000000e+00> : vector<32xf32>
    %148 = vector.multi_reduction <add>, %147, %cst_51 [0] : vector<16x32xf32> to vector<32xf32>
    %149 = vector.shape_cast %148 : vector<32xf32> to vector<1x32xf32>
    %cst_52 = arith.constant 1.250000e-01 : f32
    %150 = vector.broadcast %cst_52 : f32 to vector<1x32xf32>
    %151 = arith.mulf %149, %150 : vector<1x32xf32>
    %cst_53 = arith.constant 0.000000e+00 : f32
    %152 = vector.broadcast %cst_53 : f32 to vector<16x32xf32>
    %153 = arith.select %144, %152, %136 : vector<16x32xi1>, vector<16x32xf32>
    %cst_54 = arith.constant dense<0.000000e+00> : vector<32xf32>
    %154 = vector.multi_reduction <add>, %153, %cst_54 [0] : vector<16x32xf32> to vector<32xf32>
    %155 = vector.shape_cast %154 : vector<32xf32> to vector<1x32xf32>
    %cst_55 = arith.constant 1.250000e-01 : f32
    %156 = vector.broadcast %cst_55 : f32 to vector<1x32xf32>
    %157 = arith.mulf %155, %156 : vector<1x32xf32>
    %cst_56 = arith.constant 0.000000e+00 : f32
    %158 = vector.broadcast %cst_56 : f32 to vector<16x32xf32>
    %159 = arith.select %144, %145, %158 : vector<16x32xi1>, vector<16x32xf32>
    %cst_57 = arith.constant dense<0.000000e+00> : vector<32xf32>
    %160 = vector.multi_reduction <add>, %159, %cst_57 [0] : vector<16x32xf32> to vector<32xf32>
    %161 = vector.shape_cast %160 : vector<32xf32> to vector<1x32xf32>
    %cst_58 = arith.constant 1.250000e-01 : f32
    %162 = vector.broadcast %cst_58 : f32 to vector<1x32xf32>
    %163 = arith.mulf %161, %162 : vector<1x32xf32>
    %cst_59 = arith.constant 0.000000e+00 : f32
    %164 = vector.broadcast %cst_59 : f32 to vector<16x32xf32>
    %165 = arith.select %144, %164, %145 : vector<16x32xi1>, vector<16x32xf32>
    %cst_60 = arith.constant dense<0.000000e+00> : vector<32xf32>
    %166 = vector.multi_reduction <add>, %165, %cst_60 [0] : vector<16x32xf32> to vector<32xf32>
    %167 = vector.shape_cast %166 : vector<32xf32> to vector<1x32xf32>
    %cst_61 = arith.constant 1.250000e-01 : f32
    %168 = vector.broadcast %cst_61 : f32 to vector<1x32xf32>
    %169 = arith.mulf %167, %168 : vector<1x32xf32>
    %170 = vector.shape_cast %151 : vector<1x32xf32> to vector<1x32xf32>
    %171 = vector.broadcast %170 : vector<1x32xf32> to vector<16x32xf32>
    %172 = vector.shape_cast %157 : vector<1x32xf32> to vector<1x32xf32>
    %173 = vector.broadcast %172 : vector<1x32xf32> to vector<16x32xf32>
    %174 = arith.select %144, %171, %173 : vector<16x32xi1>, vector<16x32xf32>
    %175 = vector.shape_cast %163 : vector<1x32xf32> to vector<1x32xf32>
    %176 = vector.broadcast %175 : vector<1x32xf32> to vector<16x32xf32>
    %177 = vector.shape_cast %169 : vector<1x32xf32> to vector<1x32xf32>
    %178 = vector.broadcast %177 : vector<1x32xf32> to vector<16x32xf32>
    %179 = arith.select %144, %176, %178 : vector<16x32xi1>, vector<16x32xf32>
    %180 = arith.mulf %174, %174 : vector<16x32xf32>
    %181 = arith.subf %179, %180 : vector<16x32xf32>
    %c5 = arith.constant 5 : index
    %c0_62 = arith.constant 0 : index
    %182 = vector.load %arg4[%c5, %c0_62] : memref<24x32xf32, #tpu.memory_space<vmem>>, vector<1x32xf32>
    %cst_63 = arith.constant 9.99999974E-6 : f32
    %183 = vector.broadcast %cst_63 : f32 to vector<16x32xf32>
    %184 = arith.addf %181, %183 : vector<16x32xf32>
    %185 = math.rsqrt %184 : vector<16x32xf32>
    %186 = vector.broadcast %182 : vector<1x32xf32> to vector<16x32xf32>
    %187 = arith.mulf %186, %185 : vector<16x32xf32>
    %c6 = arith.constant 6 : index
    %c0_64 = arith.constant 0 : index
    %188 = vector.load %arg4[%c6, %c0_64] : memref<24x32xf32, #tpu.memory_space<vmem>>, vector<1x32xf32>
    %189 = arith.mulf %174, %187 : vector<16x32xf32>
    %190 = vector.broadcast %188 : vector<1x32xf32> to vector<16x32xf32>
    %191 = arith.subf %190, %189 : vector<16x32xf32>
    %192 = arith.mulf %136, %187 : vector<16x32xf32>
    %193 = arith.addf %192, %191 : vector<16x32xf32>
    %cst_65 = arith.constant 0.000000e+00 : f32
    %194 = vector.broadcast %cst_65 : f32 to vector<16x32xf32>
    %195 = arith.maximumf %193, %194 : vector<16x32xf32>
    %c80 = arith.constant 80 : index
    %c0_66 = arith.constant 0 : index
    %196 = vector.load %arg2[%c80, %c0_66] : memref<208x32xbf16, #tpu.memory_space<vmem>>, vector<32x32xbf16>
    %197 = arith.truncf %195 : vector<16x32xf32> to vector<16x32xbf16>
    %cst_67 = arith.constant dense<0.000000e+00> : vector<16x32xf32>
    %198 = tpu.matmul %197, %196, %cst_67 {dimension_numbers = #tpu.dot_dimension_numbers<[1], [0], [0], [1], [0, 0, 1, 1], [], []>} : vector<16x32xbf16>, vector<32x32xbf16>, vector<16x32xf32> -> vector<16x32xf32>
    %199 = tpu.iota {dimensions = array<i32: 0>} : vector<16x32xi32>
    %c8_i32_68 = arith.constant 8 : i32
    %200 = vector.broadcast %c8_i32_68 : i32 to vector<16x32xi32>
    %201 = arith.cmpi slt, %199, %200 : vector<16x32xi32>
    %202 = arith.mulf %198, %198 : vector<16x32xf32>
    %cst_69 = arith.constant 0.000000e+00 : f32
    %203 = vector.broadcast %cst_69 : f32 to vector<16x32xf32>
    %204 = arith.select %201, %198, %203 : vector<16x32xi1>, vector<16x32xf32>
    %cst_70 = arith.constant dense<0.000000e+00> : vector<32xf32>
    %205 = vector.multi_reduction <add>, %204, %cst_70 [0] : vector<16x32xf32> to vector<32xf32>
    %206 = vector.shape_cast %205 : vector<32xf32> to vector<1x32xf32>
    %cst_71 = arith.constant 1.250000e-01 : f32
    %207 = vector.broadcast %cst_71 : f32 to vector<1x32xf32>
    %208 = arith.mulf %206, %207 : vector<1x32xf32>
    %cst_72 = arith.constant 0.000000e+00 : f32
    %209 = vector.broadcast %cst_72 : f32 to vector<16x32xf32>
    %210 = arith.select %201, %209, %198 : vector<16x32xi1>, vector<16x32xf32>
    %cst_73 = arith.constant dense<0.000000e+00> : vector<32xf32>
    %211 = vector.multi_reduction <add>, %210, %cst_73 [0] : vector<16x32xf32> to vector<32xf32>
    %212 = vector.shape_cast %211 : vector<32xf32> to vector<1x32xf32>
    %cst_74 = arith.constant 1.250000e-01 : f32
    %213 = vector.broadcast %cst_74 : f32 to vector<1x32xf32>
    %214 = arith.mulf %212, %213 : vector<1x32xf32>
    %cst_75 = arith.constant 0.000000e+00 : f32
    %215 = vector.broadcast %cst_75 : f32 to vector<16x32xf32>
    %216 = arith.select %201, %202, %215 : vector<16x32xi1>, vector<16x32xf32>
    %cst_76 = arith.constant dense<0.000000e+00> : vector<32xf32>
    %217 = vector.multi_reduction <add>, %216, %cst_76 [0] : vector<16x32xf32> to vector<32xf32>
    %218 = vector.shape_cast %217 : vector<32xf32> to vector<1x32xf32>
    %cst_77 = arith.constant 1.250000e-01 : f32
    %219 = vector.broadcast %cst_77 : f32 to vector<1x32xf32>
    %220 = arith.mulf %218, %219 : vector<1x32xf32>
    %cst_78 = arith.constant 0.000000e+00 : f32
    %221 = vector.broadcast %cst_78 : f32 to vector<16x32xf32>
    %222 = arith.select %201, %221, %202 : vector<16x32xi1>, vector<16x32xf32>
    %cst_79 = arith.constant dense<0.000000e+00> : vector<32xf32>
    %223 = vector.multi_reduction <add>, %222, %cst_79 [0] : vector<16x32xf32> to vector<32xf32>
    %224 = vector.shape_cast %223 : vector<32xf32> to vector<1x32xf32>
    %cst_80 = arith.constant 1.250000e-01 : f32
    %225 = vector.broadcast %cst_80 : f32 to vector<1x32xf32>
    %226 = arith.mulf %224, %225 : vector<1x32xf32>
    %227 = vector.shape_cast %208 : vector<1x32xf32> to vector<1x32xf32>
    %228 = vector.broadcast %227 : vector<1x32xf32> to vector<16x32xf32>
    %229 = vector.shape_cast %214 : vector<1x32xf32> to vector<1x32xf32>
    %230 = vector.broadcast %229 : vector<1x32xf32> to vector<16x32xf32>
    %231 = arith.select %201, %228, %230 : vector<16x32xi1>, vector<16x32xf32>
    %232 = vector.shape_cast %220 : vector<1x32xf32> to vector<1x32xf32>
    %233 = vector.broadcast %232 : vector<1x32xf32> to vector<16x32xf32>
    %234 = vector.shape_cast %226 : vector<1x32xf32> to vector<1x32xf32>
    %235 = vector.broadcast %234 : vector<1x32xf32> to vector<16x32xf32>
    %236 = arith.select %201, %233, %235 : vector<16x32xi1>, vector<16x32xf32>
    %237 = arith.mulf %231, %231 : vector<16x32xf32>
    %238 = arith.subf %236, %237 : vector<16x32xf32>
    %c7 = arith.constant 7 : index
    %c0_81 = arith.constant 0 : index
    %239 = vector.load %arg4[%c7, %c0_81] : memref<24x32xf32, #tpu.memory_space<vmem>>, vector<1x32xf32>
    %cst_82 = arith.constant 9.99999974E-6 : f32
    %240 = vector.broadcast %cst_82 : f32 to vector<16x32xf32>
    %241 = arith.addf %238, %240 : vector<16x32xf32>
    %242 = math.rsqrt %241 : vector<16x32xf32>
    %243 = vector.broadcast %239 : vector<1x32xf32> to vector<16x32xf32>
    %244 = arith.mulf %243, %242 : vector<16x32xf32>
    %c8 = arith.constant 8 : index
    %c0_83 = arith.constant 0 : index
    %245 = vector.load %arg4[%c8, %c0_83] : memref<24x32xf32, #tpu.memory_space<vmem>>, vector<1x32xf32>
    %246 = arith.mulf %231, %244 : vector<16x32xf32>
    %247 = vector.broadcast %245 : vector<1x32xf32> to vector<16x32xf32>
    %248 = arith.subf %247, %246 : vector<16x32xf32>
    %249 = arith.mulf %198, %244 : vector<16x32xf32>
    %250 = arith.addf %249, %248 : vector<16x32xf32>
    %cst_84 = arith.constant 0.000000e+00 : f32
    %251 = vector.broadcast %cst_84 : f32 to vector<16x32xf32>
    %252 = arith.maximumf %250, %251 : vector<16x32xf32>
    %c112 = arith.constant 112 : index
    %c0_85 = arith.constant 0 : index
    %253 = vector.load %arg2[%c112, %c0_85] : memref<208x32xbf16, #tpu.memory_space<vmem>>, vector<32x32xbf16>
    %254 = arith.truncf %252 : vector<16x32xf32> to vector<16x32xbf16>
    %cst_86 = arith.constant dense<0.000000e+00> : vector<16x32xf32>
    %255 = tpu.matmul %254, %253, %cst_86 {dimension_numbers = #tpu.dot_dimension_numbers<[1], [0], [0], [1], [0, 0, 1, 1], [], []>} : vector<16x32xbf16>, vector<32x32xbf16>, vector<16x32xf32> -> vector<16x32xf32>
    %c9 = arith.constant 9 : index
    %c0_87 = arith.constant 0 : index
    %256 = vector.load %arg4[%c9, %c0_87] : memref<24x32xf32, #tpu.memory_space<vmem>>, vector<1x32xf32>
    %257 = vector.broadcast %256 : vector<1x32xf32> to vector<16x32xf32>
    %258 = arith.addf %255, %257 : vector<16x32xf32>
    %259 = arith.negf %258 : vector<16x32xf32>
    %260 = math.exp %259 : vector<16x32xf32>
    %cst_88 = arith.constant 1.000000e+00 : f32
    %261 = vector.broadcast %cst_88 : f32 to vector<16x32xf32>
    %262 = arith.addf %261, %260 : vector<16x32xf32>
    %263 = arith.divf %261, %262 : vector<16x32xf32>
    %cst_89 = arith.constant dense<0.000000e+00> : vector<32xf32>
    %264 = vector.multi_reduction <add>, %137, %cst_89 [0] : vector<8x32xf32> to vector<32xf32>
    %265 = vector.shape_cast %264 : vector<32xf32> to vector<1x32xf32>
    %cst_90 = arith.constant 1.250000e-01 : f32
    %266 = vector.broadcast %cst_90 : f32 to vector<1x32xf32>
    %267 = arith.mulf %265, %266 : vector<1x32xf32>
    %268 = arith.mulf %137, %137 : vector<8x32xf32>
    %cst_91 = arith.constant dense<0.000000e+00> : vector<32xf32>
    %269 = vector.multi_reduction <add>, %268, %cst_91 [0] : vector<8x32xf32> to vector<32xf32>
    %270 = vector.shape_cast %269 : vector<32xf32> to vector<1x32xf32>
    %cst_92 = arith.constant 1.250000e-01 : f32
    %271 = vector.broadcast %cst_92 : f32 to vector<1x32xf32>
    %272 = arith.mulf %270, %271 : vector<1x32xf32>
    %273 = arith.mulf %267, %267 : vector<1x32xf32>
    %274 = arith.subf %272, %273 : vector<1x32xf32>
    %c10 = arith.constant 10 : index
    %c0_93 = arith.constant 0 : index
    %275 = vector.load %arg4[%c10, %c0_93] : memref<24x32xf32, #tpu.memory_space<vmem>>, vector<1x32xf32>
    %cst_94 = arith.constant 9.99999974E-6 : f32
    %276 = vector.broadcast %cst_94 : f32 to vector<1x32xf32>
    %277 = arith.addf %274, %276 : vector<1x32xf32>
    %278 = math.rsqrt %277 : vector<1x32xf32>
    %279 = arith.mulf %275, %278 : vector<1x32xf32>
    %c11 = arith.constant 11 : index
    %c0_95 = arith.constant 0 : index
    %280 = vector.load %arg4[%c11, %c0_95] : memref<24x32xf32, #tpu.memory_space<vmem>>, vector<1x32xf32>
    %281 = arith.mulf %267, %279 : vector<1x32xf32>
    %282 = arith.subf %280, %281 : vector<1x32xf32>
    %283 = vector.broadcast %279 : vector<1x32xf32> to vector<8x32xf32>
    %284 = arith.mulf %137, %283 : vector<8x32xf32>
    %285 = vector.broadcast %282 : vector<1x32xf32> to vector<8x32xf32>
    %286 = arith.addf %284, %285 : vector<8x32xf32>
    %cst_96 = arith.constant 0.000000e+00 : f32
    %287 = vector.broadcast %cst_96 : f32 to vector<8x32xf32>
    %288 = arith.maximumf %286, %287 : vector<8x32xf32>
    %c144 = arith.constant 144 : index
    %c0_97 = arith.constant 0 : index
    %289 = vector.load %arg2[%c144, %c0_97] : memref<208x32xbf16, #tpu.memory_space<vmem>>, vector<32x32xbf16>
    %290 = arith.truncf %288 : vector<8x32xf32> to vector<8x32xbf16>
    %cst_98 = arith.constant dense<0.000000e+00> : vector<8x32xf32>
    %291 = tpu.matmul %290, %289, %cst_98 {dimension_numbers = #tpu.dot_dimension_numbers<[1], [0], [0], [1], [0, 0, 1, 1], [], []>} : vector<8x32xbf16>, vector<32x32xbf16>, vector<8x32xf32> -> vector<8x32xf32>
    %cst_99 = arith.constant dense<0.000000e+00> : vector<32xf32>
    %292 = vector.multi_reduction <add>, %291, %cst_99 [0] : vector<8x32xf32> to vector<32xf32>
    %293 = vector.shape_cast %292 : vector<32xf32> to vector<1x32xf32>
    %cst_100 = arith.constant 1.250000e-01 : f32
    %294 = vector.broadcast %cst_100 : f32 to vector<1x32xf32>
    %295 = arith.mulf %293, %294 : vector<1x32xf32>
    %296 = arith.mulf %291, %291 : vector<8x32xf32>
    %cst_101 = arith.constant dense<0.000000e+00> : vector<32xf32>
    %297 = vector.multi_reduction <add>, %296, %cst_101 [0] : vector<8x32xf32> to vector<32xf32>
    %298 = vector.shape_cast %297 : vector<32xf32> to vector<1x32xf32>
    %cst_102 = arith.constant 1.250000e-01 : f32
    %299 = vector.broadcast %cst_102 : f32 to vector<1x32xf32>
    %300 = arith.mulf %298, %299 : vector<1x32xf32>
    %301 = arith.mulf %295, %295 : vector<1x32xf32>
    %302 = arith.subf %300, %301 : vector<1x32xf32>
    %c12 = arith.constant 12 : index
    %c0_103 = arith.constant 0 : index
    %303 = vector.load %arg4[%c12, %c0_103] : memref<24x32xf32, #tpu.memory_space<vmem>>, vector<1x32xf32>
    %cst_104 = arith.constant 9.99999974E-6 : f32
    %304 = vector.broadcast %cst_104 : f32 to vector<1x32xf32>
    %305 = arith.addf %302, %304 : vector<1x32xf32>
    %306 = math.rsqrt %305 : vector<1x32xf32>
    %307 = arith.mulf %303, %306 : vector<1x32xf32>
    %c13 = arith.constant 13 : index
    %c0_105 = arith.constant 0 : index
    %308 = vector.load %arg4[%c13, %c0_105] : memref<24x32xf32, #tpu.memory_space<vmem>>, vector<1x32xf32>
    %309 = arith.mulf %295, %307 : vector<1x32xf32>
    %310 = arith.subf %308, %309 : vector<1x32xf32>
    %311 = vector.broadcast %307 : vector<1x32xf32> to vector<8x32xf32>
    %312 = arith.mulf %291, %311 : vector<8x32xf32>
    %313 = vector.broadcast %310 : vector<1x32xf32> to vector<8x32xf32>
    %314 = arith.addf %312, %313 : vector<8x32xf32>
    %cst_106 = arith.constant 0.000000e+00 : f32
    %315 = vector.broadcast %cst_106 : f32 to vector<8x32xf32>
    %316 = arith.maximumf %314, %315 : vector<8x32xf32>
    %c176 = arith.constant 176 : index
    %c0_107 = arith.constant 0 : index
    %317 = vector.load %arg2[%c176, %c0_107] : memref<208x32xbf16, #tpu.memory_space<vmem>>, vector<32x32xbf16>
    %318 = arith.truncf %316 : vector<8x32xf32> to vector<8x32xbf16>
    %cst_108 = arith.constant dense<0.000000e+00> : vector<8x32xf32>
    %319 = tpu.matmul %318, %317, %cst_108 {dimension_numbers = #tpu.dot_dimension_numbers<[1], [0], [0], [1], [0, 0, 1, 1], [], []>} : vector<8x32xbf16>, vector<32x32xbf16>, vector<8x32xf32> -> vector<8x32xf32>
    %cst_109 = arith.constant dense<0.000000e+00> : vector<32xf32>
    %320 = vector.multi_reduction <add>, %319, %cst_109 [0] : vector<8x32xf32> to vector<32xf32>
    %321 = vector.shape_cast %320 : vector<32xf32> to vector<1x32xf32>
    %cst_110 = arith.constant 1.250000e-01 : f32
    %322 = vector.broadcast %cst_110 : f32 to vector<1x32xf32>
    %323 = arith.mulf %321, %322 : vector<1x32xf32>
    %324 = arith.mulf %319, %319 : vector<8x32xf32>
    %cst_111 = arith.constant dense<0.000000e+00> : vector<32xf32>
    %325 = vector.multi_reduction <add>, %324, %cst_111 [0] : vector<8x32xf32> to vector<32xf32>
    %326 = vector.shape_cast %325 : vector<32xf32> to vector<1x32xf32>
    %cst_112 = arith.constant 1.250000e-01 : f32
    %327 = vector.broadcast %cst_112 : f32 to vector<1x32xf32>
    %328 = arith.mulf %326, %327 : vector<1x32xf32>
    %329 = arith.mulf %323, %323 : vector<1x32xf32>
    %330 = arith.subf %328, %329 : vector<1x32xf32>
    %c14 = arith.constant 14 : index
    %c0_113 = arith.constant 0 : index
    %331 = vector.load %arg4[%c14, %c0_113] : memref<24x32xf32, #tpu.memory_space<vmem>>, vector<1x32xf32>
    %cst_114 = arith.constant 9.99999974E-6 : f32
    %332 = vector.broadcast %cst_114 : f32 to vector<1x32xf32>
    %333 = arith.addf %330, %332 : vector<1x32xf32>
    %334 = math.rsqrt %333 : vector<1x32xf32>
    %335 = arith.mulf %331, %334 : vector<1x32xf32>
    %c15 = arith.constant 15 : index
    %c0_115 = arith.constant 0 : index
    %336 = vector.load %arg4[%c15, %c0_115] : memref<24x32xf32, #tpu.memory_space<vmem>>, vector<1x32xf32>
    %337 = arith.mulf %323, %335 : vector<1x32xf32>
    %338 = arith.subf %336, %337 : vector<1x32xf32>
    %339 = vector.broadcast %335 : vector<1x32xf32> to vector<8x32xf32>
    %340 = arith.mulf %319, %339 : vector<8x32xf32>
    %341 = vector.broadcast %338 : vector<1x32xf32> to vector<8x32xf32>
    %342 = arith.addf %340, %341 : vector<8x32xf32>
    %343 = arith.negf %342 : vector<8x32xf32>
    %344 = math.exp %343 : vector<8x32xf32>
    %cst_116 = arith.constant 1.000000e+00 : f32
    %345 = vector.broadcast %cst_116 : f32 to vector<8x32xf32>
    %346 = arith.addf %345, %344 : vector<8x32xf32>
    %347 = arith.divf %345, %346 : vector<8x32xf32>
    %348 = vector.extract_strided_slice %347 {offsets = [0, 0], sizes = [8, 8], strides = [1, 1]} : vector<8x32xf32> to vector<8x8xf32>
    %349 = vector.extract_strided_slice %347 {offsets = [0, 8], sizes = [8, 8], strides = [1, 1]} : vector<8x32xf32> to vector<8x8xf32>
    %350 = vector.extract_strided_slice %141 {offsets = [0, 0], sizes = [8, 16], strides = [1, 1]} : vector<8x32xf32> to vector<8x16xf32>
    %351 = vector.extract_strided_slice %141 {offsets = [0, 16], sizes = [8, 8], strides = [1, 1]} : vector<8x32xf32> to vector<8x8xf32>
    %352 = vector.extract_strided_slice %350 {offsets = [0, 0], sizes = [8, 8], strides = [1, 1]} : vector<8x16xf32> to vector<8x8xf32>
    %353 = vector.extract_strided_slice %4 {offsets = [0, 0], sizes = [8, 1], strides = [1, 1]} : vector<8x2xf32> to vector<8x1xf32>
    %354 = vector.broadcast %353 : vector<8x1xf32> to vector<8x8xf32>
    %355 = arith.mulf %352, %354 : vector<8x8xf32>
    %356 = vector.extract_strided_slice %350 {offsets = [0, 8], sizes = [8, 8], strides = [1, 1]} : vector<8x16xf32> to vector<8x8xf32>
    %357 = vector.extract_strided_slice %4 {offsets = [0, 1], sizes = [8, 1], strides = [1, 1]} : vector<8x2xf32> to vector<8x1xf32>
    %358 = vector.broadcast %357 : vector<8x1xf32> to vector<8x8xf32>
    %359 = arith.mulf %356, %358 : vector<8x8xf32>
    %360 = arith.addf %355, %359 : vector<8x8xf32>
    %361 = arith.mulf %349, %132 : vector<8x8xf32>
    %cst_117 = arith.constant dense<0.000000e+00> : vector<8xf32>
    %362 = vector.multi_reduction <add>, %361, %cst_117 [1] : vector<8x8xf32> to vector<8xf32>
    %363 = vector.shape_cast %362 : vector<8xf32> to vector<8x1xf32>
    %364 = vector.broadcast %363 : vector<8x1xf32> to vector<8x8xf32>
    %365 = arith.mulf %348, %364 : vector<8x8xf32>
    %366 = arith.addf %132, %365 : vector<8x8xf32>
    %367 = arith.addf %366, %360 : vector<8x8xf32>
    %368 = arith.addf %367, %351 : vector<8x8xf32>
    %c0_118 = arith.constant 0 : index
    %c0_119 = arith.constant 0 : index
    %369 = vector.load %arg3[%c0_118, %c0_119] : memref<8x128xbf16, #tpu.memory_space<vmem>>, vector<8x32xbf16>
    %370 = arith.truncf %368 : vector<8x8xf32> to vector<8x8xbf16>
    %cst_120 = arith.constant dense<0.000000e+00> : vector<8x32xf32>
    %371 = tpu.matmul %370, %369, %cst_120 {dimension_numbers = #tpu.dot_dimension_numbers<[1], [0], [0], [1], [0, 0, 1, 1], [], []>} : vector<8x8xbf16>, vector<8x32xbf16>, vector<8x32xf32> -> vector<8x32xf32>
    %cst_121 = arith.constant dense<0.000000e+00> : vector<32xf32>
    %372 = vector.multi_reduction <add>, %371, %cst_121 [0] : vector<8x32xf32> to vector<32xf32>
    %373 = vector.shape_cast %372 : vector<32xf32> to vector<1x32xf32>
    %cst_122 = arith.constant 1.250000e-01 : f32
    %374 = vector.broadcast %cst_122 : f32 to vector<1x32xf32>
    %375 = arith.mulf %373, %374 : vector<1x32xf32>
    %376 = arith.mulf %371, %371 : vector<8x32xf32>
    %cst_123 = arith.constant dense<0.000000e+00> : vector<32xf32>
    %377 = vector.multi_reduction <add>, %376, %cst_123 [0] : vector<8x32xf32> to vector<32xf32>
    %378 = vector.shape_cast %377 : vector<32xf32> to vector<1x32xf32>
    %cst_124 = arith.constant 1.250000e-01 : f32
    %379 = vector.broadcast %cst_124 : f32 to vector<1x32xf32>
    %380 = arith.mulf %378, %379 : vector<1x32xf32>
    %381 = arith.mulf %375, %375 : vector<1x32xf32>
    %382 = arith.subf %380, %381 : vector<1x32xf32>
    %c5_125 = arith.constant 5 : index
    %c0_126 = arith.constant 0 : index
    %383 = vector.load %arg4[%c5_125, %c0_126] : memref<24x32xf32, #tpu.memory_space<vmem>>, vector<1x32xf32>
    %cst_127 = arith.constant 9.99999974E-6 : f32
    %384 = vector.broadcast %cst_127 : f32 to vector<1x32xf32>
    %385 = arith.addf %382, %384 : vector<1x32xf32>
    %386 = math.rsqrt %385 : vector<1x32xf32>
    %387 = arith.mulf %383, %386 : vector<1x32xf32>
    %c6_128 = arith.constant 6 : index
    %c0_129 = arith.constant 0 : index
    %388 = vector.load %arg4[%c6_128, %c0_129] : memref<24x32xf32, #tpu.memory_space<vmem>>, vector<1x32xf32>
    %389 = arith.mulf %375, %387 : vector<1x32xf32>
    %390 = arith.subf %388, %389 : vector<1x32xf32>
    %391 = vector.broadcast %387 : vector<1x32xf32> to vector<8x32xf32>
    %392 = arith.mulf %371, %391 : vector<8x32xf32>
    %393 = vector.broadcast %390 : vector<1x32xf32> to vector<8x32xf32>
    %394 = arith.addf %392, %393 : vector<8x32xf32>
    %cst_130 = arith.constant 0.000000e+00 : f32
    %395 = vector.broadcast %cst_130 : f32 to vector<8x32xf32>
    %396 = arith.maximumf %394, %395 : vector<8x32xf32>
    %c80_131 = arith.constant 80 : index
    %c0_132 = arith.constant 0 : index
    %397 = vector.load %arg2[%c80_131, %c0_132] : memref<208x32xbf16, #tpu.memory_space<vmem>>, vector<32x32xbf16>
    %398 = arith.truncf %396 : vector<8x32xf32> to vector<8x32xbf16>
    %cst_133 = arith.constant dense<0.000000e+00> : vector<8x32xf32>
    %399 = tpu.matmul %398, %397, %cst_133 {dimension_numbers = #tpu.dot_dimension_numbers<[1], [0], [0], [1], [0, 0, 1, 1], [], []>} : vector<8x32xbf16>, vector<32x32xbf16>, vector<8x32xf32> -> vector<8x32xf32>
    %cst_134 = arith.constant dense<0.000000e+00> : vector<32xf32>
    %400 = vector.multi_reduction <add>, %399, %cst_134 [0] : vector<8x32xf32> to vector<32xf32>
    %401 = vector.shape_cast %400 : vector<32xf32> to vector<1x32xf32>
    %cst_135 = arith.constant 1.250000e-01 : f32
    %402 = vector.broadcast %cst_135 : f32 to vector<1x32xf32>
    %403 = arith.mulf %401, %402 : vector<1x32xf32>
    %404 = arith.mulf %399, %399 : vector<8x32xf32>
    %cst_136 = arith.constant dense<0.000000e+00> : vector<32xf32>
    %405 = vector.multi_reduction <add>, %404, %cst_136 [0] : vector<8x32xf32> to vector<32xf32>
    %406 = vector.shape_cast %405 : vector<32xf32> to vector<1x32xf32>
    %cst_137 = arith.constant 1.250000e-01 : f32
    %407 = vector.broadcast %cst_137 : f32 to vector<1x32xf32>
    %408 = arith.mulf %406, %407 : vector<1x32xf32>
    %409 = arith.mulf %403, %403 : vector<1x32xf32>
    %410 = arith.subf %408, %409 : vector<1x32xf32>
    %c7_138 = arith.constant 7 : index
    %c0_139 = arith.constant 0 : index
    %411 = vector.load %arg4[%c7_138, %c0_139] : memref<24x32xf32, #tpu.memory_space<vmem>>, vector<1x32xf32>
    %cst_140 = arith.constant 9.99999974E-6 : f32
    %412 = vector.broadcast %cst_140 : f32 to vector<1x32xf32>
    %413 = arith.addf %410, %412 : vector<1x32xf32>
    %414 = math.rsqrt %413 : vector<1x32xf32>
    %415 = arith.mulf %411, %414 : vector<1x32xf32>
    %c8_141 = arith.constant 8 : index
    %c0_142 = arith.constant 0 : index
    %416 = vector.load %arg4[%c8_141, %c0_142] : memref<24x32xf32, #tpu.memory_space<vmem>>, vector<1x32xf32>
    %417 = arith.mulf %403, %415 : vector<1x32xf32>
    %418 = arith.subf %416, %417 : vector<1x32xf32>
    %419 = vector.broadcast %415 : vector<1x32xf32> to vector<8x32xf32>
    %420 = arith.mulf %399, %419 : vector<8x32xf32>
    %421 = vector.broadcast %418 : vector<1x32xf32> to vector<8x32xf32>
    %422 = arith.addf %420, %421 : vector<8x32xf32>
    %cst_143 = arith.constant 0.000000e+00 : f32
    %423 = vector.broadcast %cst_143 : f32 to vector<8x32xf32>
    %424 = arith.maximumf %422, %423 : vector<8x32xf32>
    %c112_144 = arith.constant 112 : index
    %c0_145 = arith.constant 0 : index
    %425 = vector.load %arg2[%c112_144, %c0_145] : memref<208x32xbf16, #tpu.memory_space<vmem>>, vector<32x32xbf16>
    %426 = arith.truncf %424 : vector<8x32xf32> to vector<8x32xbf16>
    %cst_146 = arith.constant dense<0.000000e+00> : vector<8x32xf32>
    %427 = tpu.matmul %426, %425, %cst_146 {dimension_numbers = #tpu.dot_dimension_numbers<[1], [0], [0], [1], [0, 0, 1, 1], [], []>} : vector<8x32xbf16>, vector<32x32xbf16>, vector<8x32xf32> -> vector<8x32xf32>
    %c9_147 = arith.constant 9 : index
    %c0_148 = arith.constant 0 : index
    %428 = vector.load %arg4[%c9_147, %c0_148] : memref<24x32xf32, #tpu.memory_space<vmem>>, vector<1x32xf32>
    %429 = vector.broadcast %428 : vector<1x32xf32> to vector<8x32xf32>
    %430 = arith.addf %427, %429 : vector<8x32xf32>
    %431 = arith.negf %430 : vector<8x32xf32>
    %432 = math.exp %431 : vector<8x32xf32>
    %cst_149 = arith.constant 1.000000e+00 : f32
    %433 = vector.broadcast %cst_149 : f32 to vector<8x32xf32>
    %434 = arith.addf %433, %432 : vector<8x32xf32>
    %435 = arith.divf %433, %434 : vector<8x32xf32>
    %cst_150 = arith.constant 0.000000e+00 : f32
    %436 = vector.broadcast %cst_150 : f32 to vector<8x32xf32>
    %437 = vector.extract_strided_slice %263 {offsets = [0, 0], sizes = [8, 32], strides = [1, 1]} : vector<16x32xf32> to vector<8x32xf32>
    %438 = vector.extract_strided_slice %263 {offsets = [8, 0], sizes = [8, 32], strides = [1, 1]} : vector<16x32xf32> to vector<8x32xf32>
    %439 = tpu.concatenate %437, %438, %435, %436 in 1 : vector<8x32xf32>, vector<8x32xf32>, vector<8x32xf32>, vector<8x32xf32> -> vector<8x128xf32>
    %c0_151 = arith.constant 0 : index
    %c0_152 = arith.constant 0 : index
    %c0_153 = arith.constant 0 : index
    %440 = vector.load %arg5[%c0_151, %c0_152, %c0_153] : memref<1x8x128xf32, #tpu.memory_space<vmem>>, vector<1x8x128xf32>
    %441 = vector.shape_cast %440 : vector<1x8x128xf32> to vector<8x128xf32>
    %442 = vector.shape_cast %439 : vector<8x128xf32> to vector<1x8x128xf32>
    tpu.vector_store %arg5[%c0_151, %c0_152, %c0_153], %442 {strides = array<i32>} : memref<1x8x128xf32, #tpu.memory_space<vmem>>, vector<1x8x128xf32>,
    return
  }
  func.func @transform_0(%arg0: i32) -> (i32, i32, i32) {
    %c0_i32 = arith.constant 0 : i32
    %c0_i32_0 = arith.constant 0 : i32
    %c0_i32_1 = arith.constant 0 : i32
    return %arg0, %c0_i32, %c0_i32_0 : i32, i32, i32
  }
  func.func @transform_1(%arg0: i32) -> (i32, i32) {
    %c0_i32 = arith.constant 0 : i32
    %c0_i32_0 = arith.constant 0 : i32
    %c0_i32_1 = arith.constant 0 : i32
    return %c0_i32, %c0_i32_0 : i32, i32
  }
  func.func @transform_2(%arg0: i32) -> (i32, i32) {
    %c0_i32 = arith.constant 0 : i32
    %c0_i32_0 = arith.constant 0 : i32
    %c0_i32_1 = arith.constant 0 : i32
    return %c0_i32, %c0_i32_0 : i32, i32
  }
  func.func @transform_3(%arg0: i32) -> (i32, i32) {
    %c0_i32 = arith.constant 0 : i32
    %c0_i32_0 = arith.constant 0 : i32
    %c0_i32_1 = arith.constant 0 : i32
    return %c0_i32, %c0_i32_0 : i32, i32
  }
  func.func @transform_4(%arg0: i32) -> (i32, i32, i32) {
    %c0_i32 = arith.constant 0 : i32
    %c0_i32_0 = arith.constant 0 : i32
    %c0_i32_1 = arith.constant 0 : i32
    return %arg0, %c0_i32, %c0_i32_0 : i32, i32, i32
  }
}

</mosaic_0001>

<bundles_post_ra>
// kernel: e2c_forward.1
= control target key start
LH: loop header
LB: loop body
LE: loop exit
PB: predicated region body
PF: predicated region fallthrough
CT: control target
= control target key end

     0   :  { %s1818_s15 = smov 0   ;;  %s2129_s0 = inlined_call_operand.vmem [shape: f32[4,16,32], index: 0, kind: input, shape index: {}]   ;;  %s2130_s1 = inlined_call_operand.vmem [shape: bf16[208,32], index: 1, kind: input, shape index: {}]   ;;  %s2131_s2 = inlined_call_operand.vmem [shape: bf16[8,128], index: 2, kind: input, shape index: {}]   ;;  %s2132_s3 = inlined_call_operand.vmem [shape: f32[24,32], index: 3, kind: input, shape index: {}]   ;;  %s2133_s4 = inlined_call_operand.vmem [shape: f32[4,8,128], index: 4, kind: output, shape index: {}]  }
   0x1 LB: > { %s1532_s16 = sadd.s32 4294967295, %s1779_s15   ;;  %p1536_p0 = scmp.ge.s32.totalorder %s1779_s15, 1  ;;  %s1779_s15 = sphi %s1818_s15, %s14_s15  }
   0x2   : > { %p162_p1 = scmp.lt.s32.totalorder %s1779_s15, 5 }
   0x4   : > { %p163_p2 = pnand %p1536_p0, %p162_p1 }
   0x5   : > { %v1713_v0 = vld [vmem:[%s2130_s1] sm:$0xff] (!%p163_p2)   ;;  %v1781_v1 = vmov (!%p163_p2), 0.0   ;;  %p187_p3 = scmp.lt.s32.totalorder (!%p163_p2), %s1532_s16, 3  ;;  %vm1782_vm0 = vmmov (!%p163_p2), 0   ;;  %vm208_vm1 = vcmask (!%p163_p2), 130048   ;;  %v1714_v5 = vld [vmem:[%s2130_s1 + $0x8] sm:$0xff] (!%p163_p2)  }
   0x6   : > { %166 = sbr.rel (%p163_p2) target bundleno = 3750 (0xea6), region = 36  ;;  %1608 = vmatprep.subr.bf16.mxu0 (!%p163_p2), %v1781_v1  ;;  %1614 = vmatprep.subr.bf16.mxu1 (!%p163_p2), %v1781_v1  ;;  %v1715_v6 = vld [vmem:[%s2130_s1 + $0x10] sm:$0xff] (!%p163_p2)   ;;  %vm262_vm2 = vcmask (!%p163_p2), 261120   ;;  %v1542_v51 = vld [vmem:[%s2132_s3] ss:$0 sm:$0xff] (!%p163_p2)  ;;  %s1783_s17 = smov (!%p163_p2), 16  }
   0x7   : > { %1609 = vmatpush3.bf16.msra.mxu0 (!%p163_p2), %v1713_v0  ;;  %1610 = vmatprep.mubr.msk.bf16.mxu0 (!%p163_p2), %vm1782_vm0, %v1781_v1  ;;  %v1543_v55 = vld [vmem:[%s2132_s3 + $0x1] ss:$0 sm:$0xff] (!%p163_p2)  ;;  %vm589_vm3 = vcmask (!%p163_p2), 1043456   ;;  %s1784_s20 = smov (!%p163_p2), 8   ;;  %s1785_s21 = smov (!%p163_p2), 112   ;;  %vm585_vm4 = vcmask (!%p163_p2), 64512  }
   0x8   : > { %1618 = vmatprep.mubr.msk.bf16.mxu1 (!%p163_p2), %vm1782_vm0, %v1781_v1  ;;  %1622 = vmatprep.subr.bf16.mxu0 (!%p163_p2), %v1781_v1  ;;  %vm951_vm5 = vcmask (!%p163_p2), 523520   ;;  %s1786_s5 = smov (!%p163_p2), 96   ;;  %s1787_s8 = smov (!%p163_p2), 32   ;;  %vm1474_vm6 = vcmask (!%p163_p2), 523264   ;;  %vm1476_vm7 = vcmask (!%p163_p2), 785408  }
   0x9   : > { %1615 = vmatpush3.bf16.msra.mxu1 (!%p163_p2), %v1714_v5  ;;  %s1788_s24 = smov (!%p163_p2), 120   ;;  %s1791_s23 = smov (!%p163_p2), 64  }
   0xa   : > { %1616 = vmatprep.subr.bf16.mxu1 (!%p163_p2), %v1781_v1  ;;  %s1792_s25 = smov (!%p163_p2), 80  }
   0xd   : > { %s2135_s16 = smov (!%p187_p3, %s1532_s16), 3  ;;  %1617 = vmatpush3.bf16.msra.mxu1 %v1715_v6 }
   0xe   : > { %s1577_s19 = sshll.u32 %s2135_s16, 4  ;;  %1630 = vmatprep.subr.bf16.mxu1 %v1781_v1 }
   0xf   : > { %s1842_s22 = scalar_lea.vmem %s2129_s0, %s1577_s19 }
  0x10   : > { %v1845_v2 = vld [vmem:[%s1842_s22] sm:$0xff]  ;;  %v1848_v3 = vld [vmem:[%s1842_s22 + $0x8] sm:$0xff] }
  0x11   : > { %v201_v4 = vpack.c.bf16 %v1848_v3, %v1845_v2 }
  0x13   : > { %1611 = vmatmul.mubr.msk.bf16.vlgmr.msra.gmra.mrb[0].mxu0 %vm208_vm1, %v201_v4 }
  0x14   : > { %1626 = vmatprep.mubr.msk.bf16.mxu0 %vm1782_vm0, %v1781_v1 }
  0xe6   : > { %v246_v7 = vpop.f32.mrb[0].mxu0 }
  0xe7   : > { %v258_v8 = vmul.f32 %v246_v7, %v246_v7  ;;  %v263_v9 = vsel %vm262_vm2, %v246_v7, 0.0  ;;  %v1612_v10 = vpop.f32.mrb[1].mxu0 }
  0xe8   : > { %v266_v11 = vrot.slane %v263_v9, 4  ;;  %v249_v12 = vpop.f32.mrb[2].mxu0 }
  0xe9   : > { %v287_v13 = vsel %vm262_vm2, %v258_v8, 0.0  ;;  %v259_v14 = vmul.f32 %v249_v12, %v249_v12  ;;  %v276_v15 = vsel %vm262_vm2, %v249_v12, 0.0  ;;  %v1613_v16 = vpop.f32.mrb[3].mxu0  ;;  %v1716_v8 = vld [vmem:[%s2130_s1 + $0x18] sm:$0xff]  }
  0xea   : > { %v267_v17 = vadd.f32 %v266_v11, %v263_v9  ;;  %v290_v18 = vrot.slane %v287_v13, 4  ;;  %v278_v19 = vrot.slane %v276_v15, 4  ;;  %1623 = vmatpush3.bf16.msra.mxu0 %v1716_v8 }
  0xeb   : > { %v300_v20 = vsel %vm262_vm2, %v259_v14, 0.0  ;;  %1624 = vmatprep.subr.bf16.mxu0 %v1781_v1 }
  0xec   : > { %v268_v21 = vrot.slane %v267_v17, 2  ;;  %v291_v22 = vadd.f32 %v290_v18, %v287_v13  ;;  %v279_v23 = vadd.f32 %v278_v19, %v276_v15  ;;  %v302_v24 = vrot.slane %v300_v20, 4 }
  0xee   : > { %v269_v25 = vadd.f32 %v268_v21, %v267_v17  ;;  %v292_v26 = vrot.slane %v291_v22, 2  ;;  %v280_v27 = vrot.slane %v279_v23, 2  ;;  %v303_v28 = vadd.f32 %v302_v24, %v300_v20 }
  0xf0   : > { %v270_v29 = vrot.slane %v269_v25, 1  ;;  %v293_v30 = vadd.f32 %v292_v26, %v291_v22  ;;  %v281_v31 = vadd.f32 %v280_v27, %v279_v23  ;;  %v304_v32 = vrot.slane %v303_v28, 2 }
  0xf2   : > { %v271_v33 = vadd.f32 %v270_v29, %v269_v25  ;;  %v294_v34 = vrot.slane %v293_v30, 1  ;;  %v282_v35 = vrot.slane %v281_v31, 1  ;;  %v305_v36 = vadd.f32 %v304_v32, %v303_v28 }
  0xf4   : > { %v272_v37 = vmul.f32 0.125, %v271_v33  ;;  %v295_v38 = vadd.f32 %v294_v34, %v293_v30  ;;  %v283_v39 = vadd.f32 %v282_v35, %v281_v31  ;;  %v306_v40 = vrot.slane %v305_v36, 1 }
  0xf6   : > { %v296_v41 = vmul.f32 0.125, %v295_v38  ;;  %v313_v42 = vmul.f32 %v272_v37, %v272_v37  ;;  %v284_v43 = vmul.f32 0.125, %v283_v39  ;;  %v307_v44 = vadd.f32 %v306_v40, %v305_v36 }
  0xf8   : > { %v315_v45 = vsub.f32 %v296_v41, %v313_v42  ;;  %v308_v46 = vmul.f32 0.125, %v307_v44  ;;  %v314_v47 = vmul.f32 %v284_v43, %v284_v43 }
  0xfa   : > { %v318_v48 = vadd.f32 1e-05, %v315_v45  ;;  %v316_v49 = vsub.f32 %v308_v46, %v314_v47 }
  0xfc   : > { %1726 = vrsqrt.f32 %v318_v48  ;;  %v319_v50 = vadd.f32 1e-05, %v316_v49 }
  0xfe   : > { %1728 = vrsqrt.f32 %v319_v50 }
 0x106   : > { %v1727_v52 = vpop.eup %1726 }
 0x107   : > { %v326_v53 = vmul.f32 %v1727_v52, %v1542_v51 }
 0x108   : > { %v1729_v54 = vpop.eup %1728 }
 0x109   : > { %v329_v56 = vmul.f32 %v326_v53, %v272_v37  ;;  %v327_v57 = vmul.f32 %v1729_v54, %v1542_v51  ;;  %v337_v59 = vmul.f32 %v326_v53, %v246_v7  ;;  %v1717_v7 = vld [vmem:[%s2130_s1 + $0x20] sm:$0xff]  }
 0x10a   : > { %1625 = vmatpush3.bf16.msra.mxu0 %v1717_v7  ;;  %v1547_v53 = vld [vmem:[%s2132_s3 + $0x2] ss:$0 sm:$0xff] }
 0x10b   : > { %v335_v58 = vsub.f32 %v1543_v55, %v329_v56  ;;  %v330_v60 = vmul.f32 %v327_v57, %v284_v43  ;;  %v338_v63 = vmul.f32 %v327_v57, %v249_v12  ;;  %1636 = vmatprep.subr.bf16.mxu0 %v1781_v1  ;;  %v1548_v57 = vld [vmem:[%s2132_s3 + $0x3] ss:$0 sm:$0xff] }
 0x10d   : > { %v339_v61 = vadd.f32 %v337_v59, %v335_v58  ;;  %v336_v62 = vsub.f32 %v1543_v55, %v330_v60 }
 0x10f   : > { %v340_v0 = vadd.f32 %v338_v63, %v336_v62  ;;  %v341_v4 = vmax.f32 %v339_v61, 0.0 }
 0x111   : > { %v342_v5 = vmax.f32 %v340_v0, 0.0 }
 0x113   : > { %v347_v6 = vpack.c.bf16 %v342_v5, %v341_v4 }
 0x115   : > { %1619 = vmatmul.mubr.msk.bf16.vlgmr.msra.gmra.mrb[0].mxu1 %vm262_vm2, %v347_v6 }
 0x116   : > { %1632 = vmatprep.mubr.msk.bf16.mxu1 %vm1782_vm0, %v1781_v1 }
 0x1e8   : > { %v397_v9 = vpop.f32.mrb[0].mxu1 }
 0x1e9   : > { %v404_v10 = vmul.f32 %v397_v9, %v397_v9  ;;  %v408_v11 = vsel %vm262_vm2, %v397_v9, 0.0  ;;  %v1620_v12 = vpop.f32.mrb[1].mxu1 }
 0x1ea   : > { %v411_v13 = vrot.slane %v408_v11, 4  ;;  %v400_v14 = vpop.f32.mrb[2].mxu1 }
 0x1eb   : > { %v432_v15 = vsel %vm262_vm2, %v404_v10, 0.0  ;;  %v405_v16 = vmul.f32 %v400_v14, %v400_v14  ;;  %v421_v17 = vsel %vm262_vm2, %v400_v14, 0.0  ;;  %v1621_v18 = vpop.f32.mrb[3].mxu1  ;;  %v1549_v10 = vld [vmem:[%s2132_s3 + $0x4] ss:$0 sm:$0xff] }
 0x1ec   : > { %v412_v19 = vadd.f32 %v411_v13, %v408_v11  ;;  %v435_v20 = vrot.slane %v432_v15, 4  ;;  %v423_v21 = vrot.slane %v421_v17, 4 }
 0x1ed   : > { %v445_v22 = vsel %vm262_vm2, %v405_v16, 0.0 }
 0x1ee   : > { %v413_v23 = vrot.slane %v412_v19, 2  ;;  %v436_v24 = vadd.f32 %v435_v20, %v432_v15  ;;  %v424_v25 = vadd.f32 %v423_v21, %v421_v17  ;;  %v447_v26 = vrot.slane %v445_v22, 4  ;;  %v580_v20 = vld [vmem:[%s2131_s2] sm:$0xf] }
 0x1ef   : > { %v1904_v21 = vsel %vm589_vm3, %v580_v20, 0 }
 0x1f0   : > { %v414_v27 = vadd.f32 %v413_v23, %v412_v19  ;;  %v437_v28 = vrot.slane %v436_v24, 2  ;;  %v425_v29 = vrot.slane %v424_v25, 2  ;;  %v448_v30 = vadd.f32 %v447_v26, %v445_v22  ;;  %1631 = vmatpush3.bf16.msra.mxu1 %v1904_v21 }
 0x1f1   : > { %1644 = vmatprep.subr.bf16.mxu1 %v1781_v1 }
 0x1f2   : > { %v415_v31 = vrot.slane %v414_v27, 1  ;;  %v438_v32 = vadd.f32 %v437_v28, %v436_v24  ;;  %v426_v33 = vadd.f32 %v425_v29, %v424_v25  ;;  %v449_v34 = vrot.slane %v448_v30, 2 }
 0x1f4   : > { %v416_v35 = vadd.f32 %v415_v31, %v414_v27  ;;  %v439_v36 = vrot.slane %v438_v32, 1  ;;  %v427_v37 = vrot.slane %v426_v33, 1  ;;  %v450_v38 = vadd.f32 %v449_v34, %v448_v30  ;;  %v1927_v34 = vld [vmem:[%s2130_s1 + $0x30] sm:$0xff]  }
 0x1f6   : > { %v417_v39 = vmul.f32 0.125, %v416_v35  ;;  %v440_v40 = vadd.f32 %v439_v36, %v438_v32  ;;  %v428_v41 = vadd.f32 %v427_v37, %v426_v33  ;;  %v451_v42 = vrot.slane %v450_v38, 1 }
 0x1f8   : > { %v441_v43 = vmul.f32 0.125, %v440_v40  ;;  %v458_v44 = vmul.f32 %v417_v39, %v417_v39  ;;  %v429_v45 = vmul.f32 0.125, %v428_v41  ;;  %v452_v46 = vadd.f32 %v451_v42, %v450_v38 }
 0x1fa   : > { %v460_v47 = vsub.f32 %v441_v43, %v458_v44  ;;  %v453_v48 = vmul.f32 0.125, %v452_v46  ;;  %v459_v49 = vmul.f32 %v429_v45, %v429_v45 }
 0x1fc   : > { %v463_v50 = vadd.f32 1e-05, %v460_v47  ;;  %v461_v51 = vsub.f32 %v453_v48, %v459_v49 }
 0x1fe   : > { %1730 = vrsqrt.f32 %v463_v50  ;;  %v464_v52 = vadd.f32 1e-05, %v461_v51 }
 0x200   : > { %1732 = vrsqrt.f32 %v464_v52 }
 0x208   : > { %v1731_v54 = vpop.eup %1730 }
 0x209   : > { %v471_v55 = vmul.f32 %v1731_v54, %v1547_v53 }
 0x20a   : > { %v1733_v56 = vpop.eup %1732 }
 0x20b   : > { %v474_v58 = vmul.f32 %v471_v55, %v417_v39  ;;  %v472_v59 = vmul.f32 %v1733_v56, %v1547_v53  ;;  %v482_v61 = vmul.f32 %v471_v55, %v397_v9 }
 0x20d   : > { %v480_v60 = vsub.f32 %v1548_v57, %v474_v58  ;;  %v475_v62 = vmul.f32 %v472_v59, %v429_v45  ;;  %v483_v4 = vmul.f32 %v472_v59, %v400_v14 }
 0x20f   : > { %v484_v63 = vadd.f32 %v482_v61, %v480_v60  ;;  %v481_v0 = vsub.f32 %v1548_v57, %v475_v62 }
 0x211   : > { %v485_v5 = vadd.f32 %v483_v4, %v481_v0  ;;  %v486_v6 = vmax.f32 %v484_v63, 0.0 }
 0x213   : > { %v487_v8 = vmax.f32 %v485_v5, 0.0 }
 0x215   : > { %v492_v7 = vpack.c.bf16 %v487_v8, %v486_v6 }
 0x217   : > { %1627 = vmatmul.mubr.msk.bf16.vlgmr.msra.gmra.mrb[4].mxu0 %vm262_vm2, %v492_v7 }
 0x218   : > { %1640 = vmatprep.mubr.msk.bf16.mxu0 %vm1782_vm0, %v1781_v1 }
 0x2ea   : > { %v547_v11 = vpop.f32.mrb[4].mxu0 }
 0x2eb   : > { %v548_v12 = vadd.f32 %v1549_v10, %v547_v11  ;;  %v1628_v9 = vpop.f32.mrb[5].mxu0 }
 0x2ec   : > { %v550_v13 = vpop.f32.mrb[6].mxu0 }
 0x2ed   : > { %v554_v15 = vmul.f32 0.5, %v548_v12  ;;  %v551_v16 = vadd.f32 %v1549_v10, %v550_v13  ;;  %572 = vrot.lane.b32.xlu1 %v548_v12, %s1783_s17  ;;  %v1629_v14 = vpop.f32.mrb[7].mxu0 }
 0x2ef   : > { %v556_v17 = vmul.f32 1.442695, %v554_v15  ;;  %v555_v18 = vmul.f32 0.5, %v551_v16 }
 0x2f1   : > { %1734 = vpow2.f32 %v556_v17  ;;  %v558_v19 = vmul.f32 1.442695, %v555_v18  ;;  %574 = vrot.lane.b32.xlu1 %v551_v16, %s1783_s17 }
 0x2f3   : > { %1736 = vpow2.f32 %v558_v19 }
 0x2fb   : > { %v1735_v22 = vpop.eup %1734 }
 0x2fc   : > { %562 = vrot.lane.b32.xlu0 %v1735_v22, %s1784_s20 }
 0x2fd   : > { %v1737_v23 = vpop.eup %1736 }
 0x300   : > { %564 = vrot.lane.b32.xlu0 %v1737_v23, %s1784_s20 }
 0x35f   : > { %v573_v24 = vpop.permute.xlu1 %572 }
 0x363   : > { %v575_v29 = vpop.permute.xlu1 %574 }
 0x36e   : > { %v563_v25 = vpop.permute.xlu0 %562 }
 0x36f   : > { %v568_v26 = vmul.f32 %v563_v25, %v1845_v2 }
 0x371   : > { %v1910_v30 = vadd.f32 %v573_v24, %v568_v26 }
 0x372   : > { %v565_v27 = vpop.permute.xlu0 %564 }
 0x373   : > { %v569_v28 = vmul.f32 %v565_v27, %v1848_v3  ;;  %v1920_v3 = vld [vmem:[%s2130_s1 + $0x28] sm:$0xff]  }
 0x374   : > { %1637 = vmatpush3.bf16.msra.mxu0 %v1920_v3 }
 0x375   : > { %v579_v31 = vadd.f32 %v575_v29, %v569_v28  ;;  %1638 = vmatprep.subr.bf16.mxu0 %v1781_v1 }
 0x377   : > { %v581_v32 = vpack.c.bf16 %v579_v31, %v1910_v30 }
 0x378   : > { %1639 = vmatpush3.bf16.msra.mxu0 %v1927_v34 }
 0x379   : > { %583 = vrot.lane.b32.xlu0 %v581_v32, %s1785_s21  ;;  %1652 = vmatprep.subr.bf16.mxu0 %v1781_v1 }
 0x3eb   : > { %v584_v33 = vpop.permute.xlu0 %583 }
 0x3ec   : > { %1633 = vmatmul.mubr.msk.bf16.vlgmr.msra.gmra.mrb[4].mxu1 %vm585_vm4, %v584_v33  ;;  %v707_v33 = vlaneseq }
 0x3ed   : > { %1648 = vmatprep.mubr.msk.bf16.mxu1 %vm1782_vm0, %v1781_v1 }
 0x4bf   : > { %v1931_v35 = vpop.f32.mrb[4].mxu1 }
 0x4c0   : > { %v644_v36 = vmul.f32 %v1931_v35, %v1931_v35  ;;  %v648_v37 = vsel %vm262_vm2, %v1931_v35, 0.0  ;;  %v952_v38 = vsel %vm951_vm5, %v1931_v35, 0.0  ;;  %v1634_v39 = vpop.f32.mrb[5].mxu1 }
 0x4c1   : > { %v651_v40 = vrot.slane %v648_v37, 4  ;;  %v953_v41 = vrot.slane %v952_v38, 4  ;;  %v1938_v42 = vpop.f32.mrb[6].mxu1 }
 0x4c2   : > { %v672_v43 = vsel %vm262_vm2, %v644_v36, 0.0  ;;  %v960_v44 = vsel %vm951_vm5, %v644_v36, 0.0  ;;  %v645_v45 = vmul.f32 %v1938_v42, %v1938_v42  ;;  %v661_v46 = vsel %vm262_vm2, %v1938_v42, 0.0  ;;  %v1635_v47 = vpop.f32.mrb[7].mxu1 }
 0x4c3   : > { %v652_v48 = vadd.f32 %v651_v40, %v648_v37  ;;  %v675_v49 = vrot.slane %v672_v43, 4  ;;  %v954_v50 = vadd.f32 %v953_v41, %v952_v38  ;;  %v961_v51 = vrot.slane %v960_v44, 4  ;;  %v1962_v47 = vld [vmem:[%s2132_s3 + $0x6] sm:$0x1] }
 0x4c4   : > { %v663_v52 = vrot.slane %v661_v46, 4  ;;  %v685_v53 = vsel %vm262_vm2, %v645_v45, 0.0  ;;  %v708_v41 = vshrl.u32 %v707_v33, 7  ;;  %v1955_v45 = vld [vmem:[%s2132_s3 + $0x5] sm:$0x1] }
 0x4c5   : > { %v653_v54 = vrot.slane %v652_v48, 2  ;;  %v676_v55 = vadd.f32 %v675_v49, %v672_v43  ;;  %v955_v56 = vrot.slane %v954_v50, 2  ;;  %v962_v57 = vadd.f32 %v961_v51, %v960_v44 }
 0x4c6   : > { %v664_v58 = vadd.f32 %v663_v52, %v661_v46  ;;  %v687_v59 = vrot.slane %v685_v53, 4  ;;  %v1950_v44 = vsub.s32 0, %v708_v41 }
 0x4c7   : > { %v654_v60 = vadd.f32 %v653_v54, %v652_v48  ;;  %v677_v61 = vrot.slane %v676_v55, 2  ;;  %v956_v62 = vadd.f32 %v955_v56, %v954_v50  ;;  %v963_v63 = vrot.slane %v962_v57, 2 }
 0x4c8   : > { %v665_v0 = vrot.slane %v664_v58, 2  ;;  %v688_v4 = vadd.f32 %v687_v59, %v685_v53  ;;  %v710_v46 = vrot.slane %v1955_v45, %v1950_v44  ;;  %v719_v51 = vrot.slane %v1962_v47, %v1950_v44 }
 0x4c9   : > { %v678_v5 = vadd.f32 %v677_v61, %v676_v55  ;;  %v957_v6 = vrot.slane %v956_v62, 1  ;;  %v964_v8 = vadd.f32 %v963_v63, %v962_v57  ;;  %v655_v7 = vrot.slane %v654_v60, 1 }
 0x4ca   : > { %v666_v10 = vadd.f32 %v665_v0, %v664_v58  ;;  %v689_v11 = vrot.slane %v688_v4, 2 }
 0x4cb   : > { %v679_v12 = vrot.slane %v678_v5, 1  ;;  %v958_v9 = vadd.f32 %v957_v6, %v956_v62  ;;  %v965_v13 = vrot.slane %v964_v8, 1  ;;  %v656_v15 = vadd.f32 %v655_v7, %v654_v60  ;;  %v1988_v7 = vld [vmem:[%s2130_s1 + $0x40] sm:$0xff]  }
 0x4cc   : > { %v667_v16 = vrot.slane %v666_v10, 1  ;;  %v690_v14 = vadd.f32 %v689_v11, %v688_v4  ;;  %v970_v4 = vld [vmem:[%s2132_s3 + $0xa] sm:$0x1] }
 0x4cd   : > { %v680_v17 = vadd.f32 %v679_v12, %v678_v5  ;;  %v1946_v18 = vmul.f32 0.125, %v958_v9  ;;  %v966_v19 = vadd.f32 %v965_v13, %v964_v8  ;;  %v657_v20 = vmul.f32 0.125, %v656_v15  ;;  %v1981_v8 = vld [vmem:[%s2130_s1 + $0x38] sm:$0xff]  }
 0x4ce   : > { %v668_v22 = vadd.f32 %v667_v16, %v666_v10  ;;  %v691_v23 = vrot.slane %v690_v14, 1  ;;  %1645 = vmatpush3.bf16.msra.mxu1 %v1981_v8 }
 0x4cf   : > { %v681_v24 = vmul.f32 0.125, %v680_v17  ;;  %v967_v25 = vmul.f32 0.125, %v966_v19  ;;  %v968_v26 = vmul.f32 %v1946_v18, %v1946_v18  ;;  %v698_v27 = vmul.f32 %v657_v20, %v657_v20  ;;  %1646 = vmatprep.subr.bf16.mxu1 %v1781_v1 }
 0x4d0   : > { %v669_v28 = vmul.f32 0.125, %v668_v22  ;;  %v692_v29 = vadd.f32 %v691_v23, %v690_v14 }
 0x4d1   : > { %v969_v31 = vsub.f32 %v967_v25, %v968_v26  ;;  %v700_v32 = vsub.f32 %v681_v24, %v698_v27 }
 0x4d2   : > { %v693_v36 = vmul.f32 0.125, %v692_v29  ;;  %v699_v37 = vmul.f32 %v669_v28, %v669_v28  ;;  %1647 = vmatpush3.bf16.msra.mxu1 %v1988_v7 }
 0x4d3   : > { %v971_v38 = vadd.f32 1e-05, %v969_v31  ;;  %v703_v39 = vadd.f32 1e-05, %v700_v32  ;;  %1660 = vmatprep.subr.bf16.mxu1 %v1781_v1 }
 0x4d4   : > { %v701_v40 = vsub.f32 %v693_v36, %v699_v37 }
 0x4d5   : > { %1738 = vrsqrt.f32 %v971_v38 }
 0x4d6   : > { %v704_v43 = vadd.f32 1e-05, %v701_v40  ;;  %1740 = vrsqrt.f32 %v703_v39 }
 0x4d8   : > { %1742 = vrsqrt.f32 %v704_v43 }
 0x4df   : > { %v1739_v48 = vpop.eup %1738 }
 0x4e0   : > { %v1741_v49 = vpop.eup %1740  ;;  %974 = vrot.lane.b32.xlu1 %v1739_v48, %s1786_s5 }
 0x4e1   : > { %v711_v50 = vmul.f32 %v1741_v49, %v710_v46 }
 0x4e2   : > { %v1743_v52 = vpop.eup %1742 }
 0x4e3   : > { %v712_v53 = vmul.f32 %v1743_v52, %v710_v46  ;;  %v714_v54 = vmul.f32 %v711_v50, %v657_v20  ;;  %v722_v57 = vmul.f32 %v711_v50, %v1931_v35 }
 0x4e5   : > { %v715_v55 = vmul.f32 %v712_v53, %v669_v28  ;;  %v720_v56 = vsub.f32 %v719_v51, %v714_v54  ;;  %v723_v59 = vmul.f32 %v712_v53, %v1938_v42 }
 0x4e7   : > { %v721_v58 = vsub.f32 %v719_v51, %v715_v55  ;;  %v724_v60 = vadd.f32 %v722_v57, %v720_v56 }
 0x4e9   : > { %v725_v61 = vadd.f32 %v723_v59, %v721_v58  ;;  %v726_v62 = vmax.f32 %v724_v60, 0.0 }
 0x4eb   : > { %v727_v63 = vmax.f32 %v725_v61, 0.0 }
 0x4ed   : > { %v732_v0 = vpack.c.bf16 %v727_v63, %v726_v62  ;;  %v2001_v63 = vld [vmem:[%s2132_s3 + $0x7] sm:$0x1] }
 0x4ef   : > { %1641 = vmatmul.mubr.msk.bf16.vlgmr.msra.gmra.mrb[8].mxu0 %vm262_vm2, %v732_v0  ;;  %v855_v0 = vrot.slane %v2001_v63, %v1950_v44 }
 0x4f0   : > { %1656 = vmatprep.mubr.msk.bf16.mxu0 %vm1782_vm0, %v1781_v1 }
 0x552   : > { %v975_v5 = vpop.permute.xlu1 %974 }
 0x553   : > { %v977_v6 = vmul.f32 %v975_v5, %v970_v4  ;;  %v2008_v4 = vld [vmem:[%s2132_s3 + $0x8] sm:$0x1] }
 0x555   : > { %980 = vrot.lane.b32.xlu0 %v977_v6, %s1787_s8  ;;  %v992_v42 = vrot.slane %v977_v6, %v1950_v44 }
 0x559   : > { %994 = vrot.lane.b32.xlu0 %v992_v42, %s1787_s8  ;;  %v864_v42 = vrot.slane %v2008_v4, %v1950_v44 }
 0x5c2   : > { %v782_v10 = vpop.f32.mrb[8].mxu0 }
 0x5c3   : > { %v789_v11 = vmul.f32 %v782_v10, %v782_v10  ;;  %v793_v12 = vsel %vm262_vm2, %v782_v10, 0.0  ;;  %v1642_v9 = vpop.f32.mrb[9].mxu0 }
 0x5c4   : > { %v796_v13 = vrot.slane %v793_v12, 4  ;;  %v785_v15 = vpop.f32.mrb[10].mxu0 }
 0x5c5   : > { %v817_v16 = vsel %vm262_vm2, %v789_v11, 0.0  ;;  %v790_v14 = vmul.f32 %v785_v15, %v785_v15  ;;  %v806_v17 = vsel %vm262_vm2, %v785_v15, 0.0  ;;  %v1643_v19 = vpop.f32.mrb[11].mxu0 }
 0x5c6   : > { %v797_v20 = vadd.f32 %v796_v13, %v793_v12  ;;  %v820_v22 = vrot.slane %v817_v16, 4  ;;  %v808_v23 = vrot.slane %v806_v17, 4 }
 0x5c7   : > { %v830_v24 = vsel %vm262_vm2, %v790_v14, 0.0  ;;  %v981_v25 = vpop.permute.xlu0 %980 }
 0x5c8   : > { %v798_v26 = vrot.slane %v797_v20, 2  ;;  %v821_v27 = vadd.f32 %v820_v22, %v817_v16  ;;  %v809_v28 = vadd.f32 %v808_v23, %v806_v17  ;;  %v832_v29 = vrot.slane %v830_v24, 4 }
 0x5c9   : > { %v983_v31 = vmul.f32 %v981_v25, %v1946_v18 }
 0x5ca   : > { %v799_v32 = vadd.f32 %v798_v26, %v797_v20  ;;  %v822_v33 = vrot.slane %v821_v27, 2  ;;  %v810_v36 = vrot.slane %v809_v28, 2  ;;  %v833_v37 = vadd.f32 %v832_v29, %v830_v24  ;;  %v978_v26 = vld [vmem:[%s2132_s3 + $0xb] sm:$0x1]  ;;  %v1723_v29 = vld [vmem:[%s2130_s1 + $0x50] sm:$0xff]  }
 0x5cb   : > { %985 = vrot.lane.b32.xlu1 %v983_v31, %s1786_s5  ;;  %v995_v31 = vpop.permute.xlu0 %994 }
 0x5cc   : > { %v800_v38 = vrot.slane %v799_v32, 1  ;;  %v823_v39 = vadd.f32 %v822_v33, %v821_v27  ;;  %v811_v40 = vadd.f32 %v810_v36, %v809_v28  ;;  %v834_v41 = vrot.slane %v833_v37, 2 }
 0x5ce   : > { %v801_v43 = vadd.f32 %v800_v38, %v799_v32  ;;  %v824_v46 = vrot.slane %v823_v39, 1  ;;  %v812_v48 = vrot.slane %v811_v40, 1  ;;  %v835_v49 = vadd.f32 %v834_v41, %v833_v37 }
 0x5cf   : > { %v997_v32 = vmul.f32 %v995_v31, %v1931_v35 }
 0x5d0   : > { %v802_v50 = vmul.f32 0.125, %v801_v43  ;;  %v825_v51 = vadd.f32 %v824_v46, %v823_v39  ;;  %v813_v52 = vadd.f32 %v812_v48, %v811_v40  ;;  %v836_v53 = vrot.slane %v835_v49, 1  ;;  %v1724_v48 = vld [vmem:[%s2130_s1 + $0x58] sm:$0xff]  }
 0x5d2   : > { %v826_v54 = vmul.f32 0.125, %v825_v51  ;;  %v843_v18 = vmul.f32 %v802_v50, %v802_v50  ;;  %v814_v55 = vmul.f32 0.125, %v813_v52  ;;  %v837_v56 = vadd.f32 %v836_v53, %v835_v49  ;;  %v1725_v49 = vld [vmem:[%s2130_s1 + $0x60] sm:$0xff]  }
 0x5d4   : > { %v845_v57 = vsub.f32 %v826_v54, %v843_v18  ;;  %v838_v58 = vmul.f32 0.125, %v837_v56  ;;  %v844_v59 = vmul.f32 %v814_v55, %v814_v55 }
 0x5d6   : > { %v848_v60 = vadd.f32 1e-05, %v845_v57  ;;  %v846_v61 = vsub.f32 %v838_v58, %v844_v59 }
 0x5d8   : > { %1744 = vrsqrt.f32 %v848_v60  ;;  %v849_v62 = vadd.f32 1e-05, %v846_v61 }
 0x5da   : > { %1746 = vrsqrt.f32 %v849_v62 }
 0x5e2   : > { %v1745_v5 = vpop.eup %1744 }
 0x5e3   : > { %v856_v6 = vmul.f32 %v1745_v5, %v855_v0 }
 0x5e4   : > { %v1747_v11 = vpop.eup %1746 }
 0x5e5   : > { %v859_v12 = vmul.f32 %v856_v6, %v802_v50  ;;  %v857_v9 = vmul.f32 %v1747_v11, %v855_v0  ;;  %v867_v16 = vmul.f32 %v856_v6, %v782_v10 }
 0x5e7   : > { %v865_v13 = vsub.f32 %v864_v42, %v859_v12  ;;  %v860_v14 = vmul.f32 %v857_v9, %v814_v55  ;;  %v868_v20 = vmul.f32 %v857_v9, %v785_v15  ;;  %v1722_v15 = vld [vmem:[%s2130_s1 + $0x48] sm:$0xff]  }
 0x5e8   : > { %1653 = vmatpush3.bf16.msra.mxu0 %v1722_v15  ;;  %v1789_v15 = vmov 25  }
 0x5e9   : > { %v869_v17 = vadd.f32 %v867_v16, %v865_v13  ;;  %v866_v19 = vsub.f32 %v864_v42, %v860_v14  ;;  %1654 = vmatprep.subr.bf16.mxu0 %v1781_v1  ;;  %v1090_v14 = vld [vmem:[%s2132_s3 + $0xc] sm:$0x1]  ;;  %1710 = vset.pattern.permute.xlu1 %v1789_v15 }
 0x5eb   : > { %v870_v22 = vadd.f32 %v868_v20, %v866_v19  ;;  %v871_v23 = vmax.f32 %v869_v17, 0.0  ;;  %v1094_v20 = vld [vmem:[%s2132_s3 + $0xd] sm:$0x1] }
 0x5ec   : > { %1655 = vmatpush3.bf16.msra.mxu0 %v1723_v29  ;;  %v1790_v29 = vmov 24  }
 0x5ed   : > { %v872_v24 = vmax.f32 %v870_v22, 0.0  ;;  %1668 = vmatprep.subr.bf16.mxu0 %v1781_v1  ;;  %1711 = vset.pattern.permute.xlu0 %v1790_v29 }
 0x5ef   : > { %v877_v25 = vpack.c.bf16 %v872_v24, %v871_v23 }
 0x5f1   : > { %1649 = vmatmul.mubr.msk.bf16.vlgmr.msra.gmra.mrb[8].mxu1 %vm262_vm2, %v877_v25 }
 0x5f2   : > { %1664 = vmatprep.mubr.msk.bf16.mxu1 %vm1782_vm0, %v1781_v1  ;;  %1661 = vmatpush3.bf16.msra.mxu1 %v1724_v48 }
 0x5f3   : > { %1662 = vmatprep.subr.bf16.mxu1 %v1781_v1 }
 0x5f6   : > { %1663 = vmatpush3.bf16.msra.mxu1 %v1725_v49 }
 0x5f7   : > { %1674 = vmatprep.subr.bf16.mxu1 %v1781_v1 }
 0x63d   : > { %v986_v27 = vpop.permute.xlu1 %985 }
 0x63e   : > { %v988_v28 = vsub.f32 %v978_v26, %v986_v27 }
 0x640   : > { %v1001_v10 = vrot.slane %v988_v28, %v1950_v44 }
 0x642   : > { %1003 = vrot.lane.b32.xlu1 %v1001_v10, %s1787_s8 }
 0x646   : > { %1227 = vrot.lane.b32.xlu1 %v1910_v30, %s1788_s24 }
 0x64a   : > { %1217 = vperm.xlu1 %1710, %v1845_v2  }
 0x6b4   : > { %v1004_v33 = vpop.permute.xlu1 %1003 }
 0x6b5   : > { %v1006_v36 = vadd.f32 %v1004_v33, %v997_v32 }
 0x6b7   : > { %v1007_v37 = vmax.f32 %v1006_v36, 0.0 }
 0x6b9   : > { %v1012_v38 = vpack.c.bf16 %v1007_v37, %v1007_v37 }
 0x6bb   : > { %1014 = vrot.lane.b32.xlu0 %v1012_v38, %s1786_s5 }
 0x6c4   : > { %v2032_v39 = vpop.f32.mrb[8].mxu1 }
 0x6c5   : > { %v1650_v40 = vpop.f32.mrb[9].mxu1 }
 0x6c6   : > { %v2034_v41 = vpop.f32.mrb[10].mxu1 }
 0x6c7   : > { %v1651_v43 = vpop.f32.mrb[11].mxu1 }
 0x72d   : > { %v1015_v46 = vpop.permute.xlu0 %1014 }
 0x72e   : > { %1657 = vmatmul.mubr.msk.bf16.vlgmr.msra.gmra.mrb[12].mxu0 %vm262_vm2, %v1015_v46 }
 0x72f   : > { %1669 = vmatpush3.bf16.msra.mxu0 %v1904_v21  ;;  %1670 = vmatprep.mubr.msk.bf16.mxu0 %vm1782_vm0, %v1781_v1 }
 0x730   : > { %1682 = vmatprep.subr.bf16.mxu0 %v1781_v1 }
 0x801   : > { %v1065_v21 = vpop.f32.mrb[12].mxu0 }
 0x802   : > { %v1071_v50 = vsel %vm262_vm2, %v1065_v21, 0.0  ;;  %v1079_v51 = vmul.f32 %v1065_v21, %v1065_v21  ;;  %v1658_v52 = vpop.f32.mrb[13].mxu0 }
 0x803   : > { %v1072_v53 = vrot.slane %v1071_v50, 4  ;;  %v1068_v54 = vpop.f32.mrb[14].mxu0 }
 0x804   : > { %v1080_v18 = vsel %vm262_vm2, %v1079_v51, 0.0  ;;  %v1659_v55 = vpop.f32.mrb[15].mxu0 }
 0x805   : > { %v1073_v56 = vadd.f32 %v1072_v53, %v1071_v50  ;;  %v1081_v57 = vrot.slane %v1080_v18, 4 }
 0x807   : > { %v1074_v58 = vrot.slane %v1073_v56, 2  ;;  %v1082_v59 = vadd.f32 %v1081_v57, %v1080_v18 }
 0x809   : > { %v1075_v60 = vadd.f32 %v1074_v58, %v1073_v56  ;;  %v1083_v61 = vrot.slane %v1082_v59, 2  ;;  %v1187_v58 = vld [vmem:[%s2132_s3 + $0xe] sm:$0x1] }
 0x80b   : > { %v1076_v62 = vrot.slane %v1075_v60, 1  ;;  %v1084_v0 = vadd.f32 %v1083_v61, %v1082_v59  ;;  %v1191_v61 = vld [vmem:[%s2132_s3 + $0xf] sm:$0x1] }
 0x80d   : > { %v1077_v5 = vadd.f32 %v1076_v62, %v1075_v60  ;;  %v1085_v6 = vrot.slane %v1084_v0, 1 }
 0x80f   : > { %v1078_v42 = vmul.f32 0.125, %v1077_v5  ;;  %v1086_v11 = vadd.f32 %v1085_v6, %v1084_v0 }
 0x811   : > { %v1087_v12 = vmul.f32 0.125, %v1086_v11  ;;  %v1088_v9 = vmul.f32 %v1078_v42, %v1078_v42 }
 0x813   : > { %v1089_v13 = vsub.f32 %v1087_v12, %v1088_v9 }
 0x815   : > { %v1091_v16 = vadd.f32 1e-05, %v1089_v13 }
 0x817   : > { %1748 = vrsqrt.f32 %v1091_v16 }
 0x821   : > { %v1749_v17 = vpop.eup %1748 }
 0x822   : > { %v1093_v19 = vmul.f32 %v1749_v17, %v1090_v14  ;;  %v1228_v14 = vpop.permute.xlu1 %1227 }
 0x824   : > { %v1095_v22 = vmul.f32 %v1093_v19, %v1078_v42  ;;  %v1100_v23 = vrot.slane %v1093_v19, %v1950_v44  ;;  %v1554_v19 = vld [vmem:[%s2132_s3 + $0x10] ss:$0 sm:$0xff] }
 0x826   : > { %v1096_v24 = vsub.f32 %v1094_v20, %v1095_v22  ;;  %v1101_v25 = vmul.f32 %v1100_v23, %v1065_v21  ;;  %v1772_v20 = vld [vmem:[%s1842_s22] sm:$0xff] }
 0x828   : > { %v1105_v26 = vrot.slane %v1096_v24, %v1950_v44 }
 0x82a   : > { %v1106_v27 = vadd.f32 %v1105_v26, %v1101_v25  ;;  %v1218_v25 = vpop.permute.xlu1 %1217 }
 0x82c   : > { %v1107_v28 = vmax.f32 %v1106_v27, 0.0 }
 0x82e   : > { %v1112_v10 = vpack.c.bf16 %v1107_v28, %v1107_v28 }
 0x830   : > { %1665 = vmatmul.mubr.msk.bf16.vlgmr.msra.gmra.mrb[12].mxu1 %vm262_vm2, %v1112_v10 }
 0x831   : > { %1675 = vmatpush3.bf16.msra.mxu1 %v1920_v3  ;;  %1678 = vmatprep.mubr.msk.bf16.mxu1 %vm1782_vm0, %v1781_v1 }
 0x832   : > { %1676 = vmatprep.subr.bf16.mxu1 %v1781_v1 }
 0x835   : > { %1677 = vmatpush3.bf16.msra.mxu1 %v1927_v34 }
 0x903   : > { %v1162_v31 = vpop.f32.mrb[12].mxu1 }
 0x904   : > { %v1168_v32 = vsel %vm262_vm2, %v1162_v31, 0.0  ;;  %v1176_v33 = vmul.f32 %v1162_v31, %v1162_v31  ;;  %v1666_v36 = vpop.f32.mrb[13].mxu1 }
 0x905   : > { %v1169_v37 = vrot.slane %v1168_v32, 4  ;;  %v1165_v3 = vpop.f32.mrb[14].mxu1 }
 0x906   : > { %v1177_v38 = vsel %vm262_vm2, %v1176_v33, 0.0  ;;  %v1667_v40 = vpop.f32.mrb[15].mxu1 }
 0x907   : > { %v1170_v43 = vadd.f32 %v1169_v37, %v1168_v32  ;;  %v1178_v46 = vrot.slane %v1177_v38, 4 }
 0x909   : > { %v1171_v48 = vrot.slane %v1170_v43, 2  ;;  %v1179_v34 = vadd.f32 %v1178_v46, %v1177_v38 }
 0x90b   : > { %v1172_v49 = vadd.f32 %v1171_v48, %v1170_v43  ;;  %v1180_v21 = vrot.slane %v1179_v34, 2 }
 0x90d   : > { %v1173_v50 = vrot.slane %v1172_v49, 1  ;;  %v1181_v2 = vadd.f32 %v1180_v21, %v1179_v34 }
 0x90f   : > { %v1174_v51 = vadd.f32 %v1173_v50, %v1172_v49  ;;  %v1182_v52 = vrot.slane %v1181_v2, 1 }
 0x911   : > { %v1175_v53 = vmul.f32 0.125, %v1174_v51  ;;  %v1183_v54 = vadd.f32 %v1182_v52, %v1181_v2 }
 0x913   : > { %v1184_v18 = vmul.f32 0.125, %v1183_v54  ;;  %v1185_v55 = vmul.f32 %v1175_v53, %v1175_v53 }
 0x915   : > { %v1186_v56 = vsub.f32 %v1184_v18, %v1185_v55 }
 0x917   : > { %v1188_v57 = vadd.f32 1e-05, %v1186_v56 }
 0x919   : > { %1750 = vrsqrt.f32 %v1188_v57 }
 0x923   : > { %v1751_v59 = vpop.eup %1750 }
 0x924   : > { %v1190_v60 = vmul.f32 %v1751_v59, %v1187_v58 }
 0x926   : > { %v1192_v62 = vmul.f32 %v1190_v60, %v1175_v53  ;;  %v1197_v0 = vrot.slane %v1190_v60, %v1950_v44 }
 0x928   : > { %v1193_v5 = vsub.f32 %v1191_v61, %v1192_v62  ;;  %v1198_v6 = vmul.f32 %v1197_v0, %v1162_v31 }
 0x92a   : > { %v1202_v42 = vrot.slane %v1193_v5, %v1950_v44 }
 0x92c   : > { %v1203_v11 = vadd.f32 %v1202_v42, %v1198_v6 }
 0x92e   : > { %v1570_v12 = vmul.f32 -1.442695, %v1203_v11 }
 0x930   : > { %1752 = vpow2.f32 %v1570_v12 }
 0x93a   : > { %v1753_v9 = vpop.eup %1752 }
 0x93b   : > { %v1207_v13 = vadd.f32 1.0, %v1753_v9 }
 0x93d   : > { %1754 = vrcp.f32 %v1207_v13 }
 0x947   : > { %v1755_v16 = vpop.eup %1754 }
 0x948   : > { %v1230_v17 = vmul.f32 %v1755_v16, %v1228_v14 }
 0x94a   : > { %1232 = vrot.lane.b32.xlu0 %v1230_v17, %s1788_s24 }
 0x94e   : > { %640 = vrot.lane.b32.xlu0 %v1554_v19, %s1791_s23 }
 0x952   : > { %1212 = vperm.xlu0 %1711, %v1772_v20  }
 0x956   : > { %1712 = vset.pattern.permute.xlu0 %v1789_v15  ;;  %v2090_v15 = vld [vmem:[%s2132_s3 + $0x9] ss:$0 sm:$0xff] }
 0x9bc   : > { %v1233_v22 = vpop.permute.xlu0 %1232 }
 0x9bd   : > { %v1235_v23 = vsel %vm585_vm4, %v1233_v22, 0.0 }
 0x9be   : > { %1236 = vadd.xlane.f32.xlu1 %v1235_v23 }
 0x9c0   : > { %v641_v24 = vpop.permute.xlu0 %640 }
 0x9c1   : > { %v643_v26 = vadd.f32 %v641_v24, %v1931_v35  ;;  %v936_v35 = vadd.f32 %v2090_v15, %v2034_v41 }
 0x9c3   : > { %v1220_v27 = vmul.f32 %v1218_v25, %v643_v26  ;;  %v1563_v36 = vmul.f32 -1.442695, %v936_v35 }
 0x9c5   : > { %1222 = vrot.lane.b32.xlu0 %v1220_v27, %s1788_s24  ;;  %1756 = vpow2.f32 %v1563_v36 }
 0x9cf   : > { %v1757_v37 = vpop.eup %1756 }
 0x9d0   : > { %v946_v38 = vadd.f32 1.0, %v1757_v37 }
 0x9d1   : > { %v1213_v28 = vpop.permute.xlu0 %1212 }
 0x9d2   : > { %v1215_v10 = vmul.f32 %v1213_v28, %v643_v26  ;;  %1758 = vrcp.f32 %v946_v38 }
 0x9dc   : > { %v1759_v21 = vpop.eup %1758 }
 0xa37   : > { %v1223_v29 = vpop.permute.xlu0 %1222 }
 0xa38   : > { %v1225_v31 = vadd.f32 %v1223_v29, %v1215_v10 }
 0xa3a   : > { %1245 = vrot.lane.b32.xlu0 %v1225_v31, %s1792_s25 }
 0xa4b   : > { %v1237_v32 = vpop.xlane.xlu1 %1236 }
 0xa4c   : > { %v1238_v33 = vmul.f32 %v1755_v16, %v1237_v32 }
 0xa4e   : > { %1240 = vrot.lane.b32.xlu0 %v1238_v33, %s1783_s17  ;;  %s1539_s17 = sshll.u32 %s2135_s16, 3 }
 0xa4f   : > { %s195_s24 = scalar_lea.vmem %s2133_s4, %s1539_s17 }
 0xa52   : > { %1250 = vrot.lane.b32.xlu0 %v643_v26, %s1791_s23 }
 0xaac   : > { %v1246_v3 = vpop.permute.xlu0 %1245 }
 0xac0   : > { %v1241_v40 = vpop.permute.xlu0 %1240 }
 0xac1   : > { %v1243_v43 = vadd.f32 %v1241_v40, %v1910_v30 }
 0xac3   : > { %v1248_v46 = vadd.f32 %v1246_v3, %v1243_v43 }
 0xac4   : > { %v1251_v48 = vpop.permute.xlu0 %1250 }
 0xac5   : > { %v1253_v34 = vadd.f32 %v1251_v48, %v1248_v46 }
 0xac7   : > { %v1254_v49 = vpack.c.bf16 %v1253_v34, %v1253_v34 }
 0xac9   : > { %1256 = vrot.lane.b32.xlu0 %v1254_v49, %s1785_s21 }
 0xacd   : > { %1466 = vrot.lane.b32.xlu0 %v1759_v21, %s1787_s8 }
 0xb3b   : > { %v1257_v50 = vpop.permute.xlu0 %1256 }
 0xb3c   : > { %1671 = vmatmul.mubr.msk.bf16.vlgmr.msra.gmra.mrb[16].mxu0 %vm585_vm4, %v1257_v50 }
 0xb3d   : > { %1683 = vmatpush3.bf16.msra.mxu0 %v1981_v8  ;;  %1686 = vmatprep.mubr.msk.bf16.mxu0 %vm1782_vm0, %v1781_v1 }
 0xb3e   : > { %1684 = vmatprep.subr.bf16.mxu0 %v1781_v1 }
 0xb41   : > { %1685 = vmatpush3.bf16.msra.mxu0 %v1988_v7 }
 0xc0f   : > { %v1295_v30 = vpop.f32.mrb[16].mxu0 }
 0xc10   : > { %v1301_v41 = vsel %vm262_vm2, %v1295_v30, 0.0  ;;  %v1309_v2 = vmul.f32 %v1295_v30, %v1295_v30  ;;  %v1672_v51 = vpop.f32.mrb[17].mxu0 }
 0xc11   : > { %v1302_v52 = vrot.slane %v1301_v41, 4  ;;  %v1298_v53 = vpop.f32.mrb[18].mxu0 }
 0xc12   : > { %v1310_v54 = vsel %vm262_vm2, %v1309_v2, 0.0  ;;  %v1673_v18 = vpop.f32.mrb[19].mxu0 }
 0xc13   : > { %v1303_v55 = vadd.f32 %v1302_v52, %v1301_v41  ;;  %v1311_v56 = vrot.slane %v1310_v54, 4 }
 0xc15   : > { %v1304_v8 = vrot.slane %v1303_v55, 2  ;;  %v1312_v57 = vadd.f32 %v1311_v56, %v1310_v54 }
 0xc17   : > { %v1305_v58 = vadd.f32 %v1304_v8, %v1303_v55  ;;  %v1313_v59 = vrot.slane %v1312_v57, 2 }
 0xc19   : > { %v1306_v60 = vrot.slane %v1305_v58, 1  ;;  %v1314_v1 = vadd.f32 %v1313_v59, %v1312_v57 }
 0xc1b   : > { %v1307_v61 = vadd.f32 %v1306_v60, %v1305_v58  ;;  %v1315_v7 = vrot.slane %v1314_v1, 1 }
 0xc1d   : > { %v1308_v62 = vmul.f32 0.125, %v1307_v61  ;;  %v1316_v0 = vadd.f32 %v1315_v7, %v1314_v1 }
 0xc1f   : > { %v1317_v5 = vmul.f32 0.125, %v1316_v0  ;;  %v1318_v6 = vmul.f32 %v1308_v62, %v1308_v62  ;;  %v1467_v0 = vpop.permute.xlu0 %1466 }
 0xc21   : > { %v1319_v42 = vsub.f32 %v1317_v5, %v1318_v6 }
 0xc23   : > { %v1320_v11 = vadd.f32 1e-05, %v1319_v42 }
 0xc25   : > { %1760 = vrsqrt.f32 %v1320_v11 }
 0xc2f   : > { %v1761_v12 = vpop.eup %1760 }
 0xc30   : > { %v1322_v9 = vmul.f32 %v1761_v12, %v1955_v45 }
 0xc32   : > { %v1323_v13 = vmul.f32 %v1322_v9, %v1308_v62  ;;  %v1328_v16 = vrot.slane %v1322_v9, %v1950_v44 }
 0xc34   : > { %v1324_v14 = vsub.f32 %v1962_v47, %v1323_v13  ;;  %v1329_v17 = vmul.f32 %v1328_v16, %v1295_v30 }
 0xc36   : > { %v1333_v19 = vrot.slane %v1324_v14, %v1950_v44 }
 0xc38   : > { %v1334_v20 = vadd.f32 %v1333_v19, %v1329_v17 }
 0xc3a   : > { %v1335_v22 = vmax.f32 %v1334_v20, 0.0 }
 0xc3c   : > { %v1336_v23 = vpack.c.bf16 %v1335_v22, %v1335_v22 }
 0xc3e   : > { %1679 = vmatmul.mubr.msk.bf16.vlgmr.msra.gmra.mrb[16].mxu1 %vm262_vm2, %v1336_v23 }
 0xd11   : > { %v1374_v24 = vpop.f32.mrb[16].mxu1 }
 0xd12   : > { %v1380_v25 = vsel %vm262_vm2, %v1374_v24, 0.0  ;;  %v1388_v26 = vmul.f32 %v1374_v24, %v1374_v24  ;;  %v1680_v27 = vpop.f32.mrb[17].mxu1 }
 0xd13   : > { %v1381_v28 = vrot.slane %v1380_v25, 4  ;;  %v1377_v45 = vpop.f32.mrb[18].mxu1 }
 0xd14   : > { %v1389_v10 = vsel %vm262_vm2, %v1388_v26, 0.0  ;;  %v1681_v29 = vpop.f32.mrb[19].mxu1 }
 0xd15   : > { %v1382_v31 = vadd.f32 %v1381_v28, %v1380_v25  ;;  %v1390_v47 = vrot.slane %v1389_v10, 4 }
 0xd17   : > { %v1383_v32 = vrot.slane %v1382_v31, 2  ;;  %v1391_v33 = vadd.f32 %v1390_v47, %v1389_v10 }
 0xd19   : > { %v1384_v35 = vadd.f32 %v1383_v32, %v1382_v31  ;;  %v1392_v36 = vrot.slane %v1391_v33, 2 }
 0xd1b   : > { %v1385_v37 = vrot.slane %v1384_v35, 1  ;;  %v1393_v3 = vadd.f32 %v1392_v36, %v1391_v33 }
 0xd1d   : > { %v1386_v38 = vadd.f32 %v1385_v37, %v1384_v35  ;;  %v1394_v40 = vrot.slane %v1393_v3, 1 }
 0xd1f   : > { %v1387_v43 = vmul.f32 0.125, %v1386_v38  ;;  %v1395_v46 = vadd.f32 %v1394_v40, %v1393_v3 }
 0xd21   : > { %v1396_v48 = vmul.f32 0.125, %v1395_v46  ;;  %v1397_v34 = vmul.f32 %v1387_v43, %v1387_v43 }
 0xd23   : > { %v1398_v49 = vsub.f32 %v1396_v48, %v1397_v34 }
 0xd25   : > { %v1399_v21 = vadd.f32 1e-05, %v1398_v49 }
 0xd27   : > { %1762 = vrsqrt.f32 %v1399_v21 }
 0xd31   : > { %v1763_v50 = vpop.eup %1762 }
 0xd32   : > { %v1401_v30 = vmul.f32 %v1763_v50, %v2001_v63 }
 0xd34   : > { %v1402_v41 = vmul.f32 %v1401_v30, %v1387_v43  ;;  %v1407_v2 = vrot.slane %v1401_v30, %v1950_v44 }
 0xd36   : > { %v1403_v51 = vsub.f32 %v2008_v4, %v1402_v41  ;;  %v1408_v52 = vmul.f32 %v1407_v2, %v1374_v24 }
 0xd38   : > { %v1412_v53 = vrot.slane %v1403_v51, %v1950_v44  ;;  %v933_v44 = vadd.f32 %v2090_v15, %v2032_v39 }
 0xd3a   : > { %v1413_v54 = vadd.f32 %v1412_v53, %v1408_v52  ;;  %v1562_v61 = vmul.f32 -1.442695, %v933_v44 }
 0xd3c   : > { %v1414_v18 = vmax.f32 %v1413_v54, 0.0 }
 0xd3e   : > { %v1415_v55 = vpack.c.bf16 %v1414_v18, %v1414_v18 }
 0xd40   : > { %1687 = vmatmul.mubr.msk.bf16.vlgmr.msra.gmra.mrb[20].mxu0 %vm262_vm2, %v1415_v55 }
 0xe13   : > { %v1453_v56 = vpop.f32.mrb[20].mxu0 }
 0xe14   : > { %v1454_v8 = vadd.f32 %v2090_v15, %v1453_v56  ;;  %v1688_v57 = vpop.f32.mrb[21].mxu0 }
 0xe15   : > { %v1456_v58 = vpop.f32.mrb[22].mxu0 }
 0xe16   : > { %v1574_v63 = vmul.f32 -1.442695, %v1454_v8  ;;  %v1689_v59 = vpop.f32.mrb[23].mxu0 }
 0xe18   : > { %1764 = vpow2.f32 %v1574_v63 }
 0xe22   : > { %v1765_v60 = vpop.eup %1764 }
 0xe23   : > { %v1462_v1 = vadd.f32 1.0, %v1765_v60 }
 0xe25   : > { %1766 = vrcp.f32 %v1462_v1 }
 0xe26   : > { %1768 = vpow2.f32 %v1562_v61 }
 0xe2f   : > { %v1767_v4 = vpop.eup %1766 }
 0xe30   : > { %1470 = vrot.lane.b32.xlu0 %v1767_v4, %s1791_s23  ;;  %v1769_v7 = vpop.eup %1768 }
 0xe31   : > { %v945_v62 = vadd.f32 1.0, %v1769_v7 }
 0xe33   : > { %1770 = vrcp.f32 %v945_v62 }
 0xe3d   : > { %v1771_v5 = vpop.eup %1770 }
 0xe3e   : > { %v1473_v6 = vsel %vm262_vm2, %v1771_v5, %v1467_v0 }
 0xea2   : > { %v1471_v42 = vpop.permute.xlu0 %1470 }
 0xea3   : > { %v1475_v11 = vsel %vm1474_vm6, %v1473_v6, %v1471_v42 }
 0xea4   : > { %v1477_v12 = vsel %vm1476_vm7, %v1475_v11, 0.0 }
 0xea5   : > { %1478 = vst [vmem:[%s195_s24] sm:$0xff] %v1477_v12 }
 0xea6 PF: > { %s14_s15 = sadd.s32 1, %s1779_s15  }
 0xea7   : > { %p11_p4 = scmp.ge.s32.totalorder %s14_s15, 6  }
 0xea9   :  { %13 = sbr.rel (!%p11_p4) target bundleno = 1 (0x1), region = 66 }

</bundles_post_ra>
